<compile_context>
chip_gen: v7x
topology: tpu7x:2x2x1
jax: 0.10.0
libtpu: 0.0.40
codegen_flags: <defaults>
</compile_context>

<pallas_src>
import functools

import jax
import jax.numpy as jnp
from jax.experimental import pallas as pl
from jax.experimental.pallas import tpu as pltpu

_LANE = 128  # padded classifier width -> unmasked full-lane output stores


def _round_up(a, m):
    return (a + m - 1) // m * m


def _band_weights(w_hwio, width):
    """(3,3,Cin,Cout) conv weights -> (3, W*Cin, W*Cout) banded matrices.

    bw[ky, wi*Cin+ci, wo*Cout+co] = w[ky, wi-wo+1, ci, co] when 0 <= wi-wo+1 < 3
    else 0, so `x2d[rows, W*Cin] @ bw[ky]` performs a "same"-padded conv along
    W for kernel row ky (the missing band entries *are* the zero padding).
    """
    kh, kw, cin, cout = w_hwio.shape
    kx = jnp.arange(kw)[:, None, None]
    wi = jnp.arange(width)[None, :, None]
    wo = jnp.arange(width)[None, None, :]
    sel = (wi == wo + kx - (kw // 2)).astype(w_hwio.dtype)      # (kw, W, W)
    bw = jnp.einsum("ykio,kab->yaibo", w_hwio, sel)             # (kh, W, Cin, W, Cout)
    return bw.reshape(kh, width * cin, width * cout)


def _uncoiler_kernel(x_ref, bw1_ref, b1_ref, bw2_ref, b2_ref, fcw_ref, fcb_ref,
                     o_ref, c1h_ref, *, h, bt):
    # x_ref:   (h, bt, 3*W*Cin)  bf16, im2row-packed over the 3 kernel rows
    # bw1_ref: (3*W*Cin, W*C1)   bf16 banded conv1 weights (ky-packed along K)
    # b1_ref:  (1, W*C1)         f32 conv1 bias tiled over W
    # bw2_ref: (3*W*C1, W*C2)    bf16 banded conv2 weights (ky-packed along K)
    # b2_ref:  (1, W*C2)         f32
    # fcw_ref: (W*C2, 128)       bf16 fc weights tiled over W, scaled by 1/(H*W)
    # fcb_ref: (1, 128)          f32
    # o_ref:   (bt, 128)         f32 logits (lane-padded to 128)
    # c1h_ref: (h+2, bt, W*C1)   bf16 scratch: conv1 output with zero row halos
    k1 = x_ref.shape[-1]
    wc1 = bw1_ref.shape[-1]
    wc2 = bw2_ref.shape[-1]

    # ---- conv1 + relu: one MXU matmul, M = h*bt, K = 3*W*Cin --------------
    x2d = x_ref[...].reshape(h * bt, k1)                       # free merge
    acc1 = jnp.dot(x2d, bw1_ref[...], preferred_element_type=jnp.float32)
    c1 = jnp.maximum(acc1 + b1_ref[...], 0.0)                  # (h*bt, W*C1)

    # Stash conv1 output (bf16) into the row-halo'd scratch; rows 0 and h+1
    # are the zero halo, interior rows 1..h hold conv1 rows 0..h-1.
    zero = jnp.zeros((bt, wc1), c1h_ref.dtype)
    c1h_ref[0] = zero
    c1h_ref[h + 1] = zero
    c1h_ref[pl.ds(1, h)] = c1.astype(c1h_ref.dtype).reshape(h, bt, wc1)

    # ---- conv2 + relu: K-packed im2row read from scratch ------------------
    # Three lane-aligned (h*bt, W*C1) slabs -> one (h*bt, 3*W*C1) LHS.
    lhs2 = jnp.concatenate(
        [c1h_ref[pl.ds(ky, h)].reshape(h * bt, wc1) for ky in range(3)],
        axis=-1)                                               # (h*bt, 384) bf16
    acc2 = b2_ref[...] + jnp.dot(lhs2, bw2_ref[...],
                                 preferred_element_type=jnp.float32)
    c2 = jnp.maximum(acc2, 0.0)                                # (h*bt, W*C2)

    # ---- global avg pool + flatten + fc head ------------------------------
    # 1/(H*W) and the tiling over W positions are folded into fcw, so the pool
    # is a sum over the h row-slabs and the head is one K=W*C2 matmul.
    pooled = jnp.sum(c2.reshape(h, bt, wc2), axis=0)           # (bt, W*C2) f32
    logits = jnp.dot(pooled.astype(fcw_ref.dtype), fcw_ref[...],
                     preferred_element_type=jnp.float32) + fcb_ref[...]
    o_ref[...] = logits                                        # (bt, 128) unmasked


def uncoiler_forward(params, x_nchw):
    n, cin, h, w = x_nchw.shape
    c1 = params["conv1_b"].shape[0]
    c2 = params["conv2_b"].shape[0]
    ncls = params["fc_b"].shape[0]
    # avg_pool2d(kernel=W) as a global mean only coincides with mean over
    # (H, W) for square maps, which is what the reference module implies.
    assert h == w, "Uncoiler pool fold assumes square feature maps (H == W)"

    # Batch tile: >=16 so M = bt*h >= 256 fills the MXU sublane dim and all
    # in-kernel leading-dim reshapes stay tile-aligned.
    bt = min(32, _round_up(max(n, 1), 16))
    n_pad = _round_up(n, bt)

    # NCHW -> NHWC -> (N, H, W*Cin); zero-pad rows by 1; im2row-pack the 3
    # kernel rows along lanes (K = 3*W*Cin); pad batch; lay out as
    # (H, N_pad, K) so the kernel's (h, bt) -> h*bt merge is free.
    xr = jnp.transpose(x_nchw, (0, 2, 3, 1)).astype(jnp.float32)
    xr = xr.reshape(n, h, w * cin)
    xr = jnp.pad(xr, ((0, n_pad - n), (1, 1), (0, 0)))
    xp = jnp.concatenate([xr[:, ky:ky + h, :] for ky in range(3)], axis=-1)
    xp = jnp.transpose(xp, (1, 0, 2)).astype(jnp.bfloat16)     # (h, n_pad, 3*w*cin)

    f32 = jnp.float32
    bf16 = jnp.bfloat16
    bw1 = _band_weights(params["conv1_w"].astype(f32), w)
    bw1 = bw1.reshape(3 * w * cin, w * c1).astype(bf16)        # (192, 128)
    bw2 = _band_weights(params["conv2_w"].astype(f32), w)
    bw2 = bw2.reshape(3 * w * c1, w * c2).astype(bf16)         # (384, 256)
    b1r = jnp.tile(params["conv1_b"].astype(f32), w)[None, :]  # (1, 128)
    b2r = jnp.tile(params["conv2_b"].astype(f32), w)[None, :]  # (1, 256)
    # Fold the global average pool (sum over W positions, 1/(H*W)) into the fc
    # weights; pad the 10-wide head to 128 lanes (sliced back below).
    fcw = jnp.pad(params["fc_w"].astype(f32), ((0, 0), (0, _LANE - ncls)))
    fcw = (jnp.tile(fcw, (w, 1)) * (1.0 / (h * w))).astype(bf16)   # (256, 128)
    fcb = jnp.pad(params["fc_b"].astype(f32), (0, _LANE - ncls))[None, :]

    flops = n_pad * (2 * h * (3 * w * cin) * (w * c1)
                     + 2 * h * (3 * w * c1) * (w * c2)
                     + 2 * (w * c2) * _LANE)
    bytes_accessed = (xp.size + bw1.size + bw2.size + fcw.size) * 2 \
        + (b1r.size + b2r.size + fcb.size) * 4 + n_pad * _LANE * 4

    out = pl.pallas_call(
        functools.partial(_uncoiler_kernel, h=h, bt=bt),
        out_shape=jax.ShapeDtypeStruct((n_pad, _LANE), jnp.float32),
        grid=(n_pad // bt,),
        in_specs=[
            pl.BlockSpec((h, bt, 3 * w * cin), lambda i: (0, i, 0)),
            # Weight blocks have constant index maps -> fetched once, resident.
            pl.BlockSpec((3 * w * cin, w * c1), lambda i: (0, 0)),
            pl.BlockSpec((1, w * c1), lambda i: (0, 0)),
            pl.BlockSpec((3 * w * c1, w * c2), lambda i: (0, 0)),
            pl.BlockSpec((1, w * c2), lambda i: (0, 0)),
            pl.BlockSpec((w * c2, _LANE), lambda i: (0, 0)),
            pl.BlockSpec((1, _LANE), lambda i: (0, 0)),
        ],
        out_specs=pl.BlockSpec((bt, _LANE), lambda i: (i, 0)),
        scratch_shapes=[pltpu.VMEM((h + 2, bt, w * c1), jnp.bfloat16)],
        compiler_params=pltpu.CompilerParams(
            dimension_semantics=("parallel",)),
        cost_estimate=pl.CostEstimate(flops=flops, transcendentals=0,
                                      bytes_accessed=bytes_accessed),
    )(xp, bw1, b1r, bw2, b2r, fcw, fcb)
    return out[:n, :ncls]


def uncoiler_reference(params, x_nchw):
    """Pure-JAX f32 reference of the same forward pass (for validation)."""
    x = jnp.transpose(x_nchw, (0, 2, 3, 1)).astype(jnp.float32)

    def conv_relu(z, wk, bk):
        z = jax.lax.conv_general_dilated(
            z, wk, (1, 1), "SAME",
            dimension_numbers=("NHWC", "HWIO", "NHWC"))
        return jnp.maximum(z + bk, 0.0)

    x = conv_relu(x, params["conv1_w"], params["conv1_b"])
    x = conv_relu(x, params["conv2_w"], params["conv2_b"])
    pooled = jnp.mean(x, axis=(1, 2))
    return pooled @ params["fc_w"] + params["fc_b"]


def init_params(key):
    k1, k2, k3, k4, k5, k6 = jax.random.split(key, 6)
    return {
        "conv1_w": 0.1 * jax.random.normal(k1, (3, 3, 4, 8), jnp.float32),
        "conv1_b": 0.1 * jax.random.normal(k2, (8,), jnp.float32),
        "conv2_w": 0.1 * jax.random.normal(k3, (3, 3, 8, 16), jnp.float32),
        "conv2_b": 0.1 * jax.random.normal(k4, (16,), jnp.float32),
        # Linear stored as (in, out); y = pooled @ W + b (same map as PyTorch
        # x @ W.T + b with W of shape (out, in)).
        "fc_w": 0.1 * jax.random.normal(k5, (16, 10), jnp.float32),
        "fc_b": 0.1 * jax.random.normal(k6, (10,), jnp.float32),
    }


if __name__ == "__main__":
    key = jax.random.PRNGKey(0)
    pkey, xkey = jax.random.split(key)
    params = init_params(pkey)
    x = jax.random.normal(xkey, (2, 4, 16, 16), jnp.float32)  # NCHW, square

    out = jax.jit(uncoiler_forward)(params, x)
    out = jax.block_until_ready(out)
    assert out.shape == (2, 10) and out.dtype == jnp.float32

    ref = uncoiler_reference(params, x)
    # bf16 matmul operands with f32 accumulation -> slightly looser tolerance.
    assert jnp.allclose(out, ref, rtol=2e-2, atol=2e-2), (
        float(jnp.max(jnp.abs(out - ref))))
    print("KERNEL_OK")
</pallas_src>

<mosaic_0001>
module attributes {stable_mosaic.version = 11 : i64} {
  func.func @_uncoiler_kernel(%arg0: i32, %arg1: memref<16x16x192xbf16, #tpu.memory_space<vmem>>, %arg2: memref<192x128xbf16, #tpu.memory_space<vmem>>, %arg3: memref<1x128xf32, #tpu.memory_space<vmem>>, %arg4: memref<384x256xbf16, #tpu.memory_space<vmem>>, %arg5: memref<1x256xf32, #tpu.memory_space<vmem>>, %arg6: memref<256x128xbf16, #tpu.memory_space<vmem>>, %arg7: memref<1x128xf32, #tpu.memory_space<vmem>>, %arg8: memref<16x128xf32, #tpu.memory_space<vmem>>, %arg9: memref<18x16x128xbf16, #tpu.memory_space<vmem>>) attributes {dimension_semantics = [#tpu.dimension_semantics<parallel>], iteration_bounds = array<i64: 1>, scalar_prefetch = 0 : i64, scratch_operands = 1 : i64, tpu.core_type = #tpu.core_type<tc>, window_params = [{transform_indices = @transform_0, window_bounds = array<i64: 16, 16, 192>}, {pipeline_mode = #tpu.pipeline_mode<synchronous>, transform_indices = @transform_1, window_bounds = array<i64: 192, 128>}, {pipeline_mode = #tpu.pipeline_mode<synchronous>, transform_indices = @transform_2, window_bounds = array<i64: 1, 128>}, {pipeline_mode = #tpu.pipeline_mode<synchronous>, transform_indices = @transform_3, window_bounds = array<i64: 384, 256>}, {pipeline_mode = #tpu.pipeline_mode<synchronous>, transform_indices = @transform_4, window_bounds = array<i64: 1, 256>}, {pipeline_mode = #tpu.pipeline_mode<synchronous>, transform_indices = @transform_5, window_bounds = array<i64: 256, 128>}, {pipeline_mode = #tpu.pipeline_mode<synchronous>, transform_indices = @transform_6, window_bounds = array<i64: 1, 128>}, {transform_indices = @transform_7, window_bounds = array<i64: 16, 128>}]} {
    %c0 = arith.constant 0 : index
    %c0_0 = arith.constant 0 : index
    %c0_1 = arith.constant 0 : index
    %0 = vector.load %arg1[%c0, %c0_0, %c0_1] : memref<16x16x192xbf16, #tpu.memory_space<vmem>>, vector<16x16x192xbf16>
    %1 = vector.shape_cast %0 : vector<16x16x192xbf16> to vector<256x192xbf16>
    %c0_2 = arith.constant 0 : index
    %c0_3 = arith.constant 0 : index
    %2 = vector.load %arg2[%c0_2, %c0_3] : memref<192x128xbf16, #tpu.memory_space<vmem>>, vector<192x128xbf16>
    %cst = arith.constant dense<0.000000e+00> : vector<256x128xf32>
    %3 = tpu.matmul %1, %2, %cst {dimension_numbers = #tpu.dot_dimension_numbers<[1], [0], [0], [1], [0, 0, 1, 1], [], []>} : vector<256x192xbf16>, vector<192x128xbf16>, vector<256x128xf32> -> vector<256x128xf32>
    %c0_4 = arith.constant 0 : index
    %c0_5 = arith.constant 0 : index
    %4 = vector.load %arg3[%c0_4, %c0_5] : memref<1x128xf32, #tpu.memory_space<vmem>>, vector<1x128xf32>
    %5 = vector.broadcast %4 : vector<1x128xf32> to vector<256x128xf32>
    %6 = arith.addf %3, %5 : vector<256x128xf32>
    %cst_6 = arith.constant 0.000000e+00 : f32
    %7 = vector.broadcast %cst_6 : f32 to vector<256x128xf32>
    %8 = arith.maximumf %6, %7 : vector<256x128xf32>
    %cst_7 = arith.constant 0.000000e+00 : bf16
    %9 = vector.broadcast %cst_7 : bf16 to vector<16x128xbf16>
    %c0_8 = arith.constant 0 : index
    %c0_9 = arith.constant 0 : index
    %c0_10 = arith.constant 0 : index
    %10 = vector.load %arg9[%c0_8, %c0_9, %c0_10] : memref<18x16x128xbf16, #tpu.memory_space<vmem>>, vector<1x16x128xbf16>
    %11 = vector.shape_cast %10 : vector<1x16x128xbf16> to vector<16x128xbf16>
    %12 = vector.shape_cast %9 : vector<16x128xbf16> to vector<1x16x128xbf16>
    tpu.vector_store %arg9[%c0_8, %c0_9, %c0_10], %12 {strides = array<i32>} : memref<18x16x128xbf16, #tpu.memory_space<vmem>>, vector<1x16x128xbf16>,
    %c17 = arith.constant 17 : index
    %c0_11 = arith.constant 0 : index
    %c0_12 = arith.constant 0 : index
    %13 = vector.load %arg9[%c17, %c0_11, %c0_12] : memref<18x16x128xbf16, #tpu.memory_space<vmem>>, vector<1x16x128xbf16>
    %14 = vector.shape_cast %13 : vector<1x16x128xbf16> to vector<16x128xbf16>
    %15 = vector.shape_cast %9 : vector<16x128xbf16> to vector<1x16x128xbf16>
    tpu.vector_store %arg9[%c17, %c0_11, %c0_12], %15 {strides = array<i32>} : memref<18x16x128xbf16, #tpu.memory_space<vmem>>, vector<1x16x128xbf16>,
    %16 = arith.truncf %8 : vector<256x128xf32> to vector<256x128xbf16>
    %17 = vector.shape_cast %16 : vector<256x128xbf16> to vector<16x16x128xbf16>
    %c1 = arith.constant 1 : index
    %c0_13 = arith.constant 0 : index
    %c0_14 = arith.constant 0 : index
    %18 = vector.load %arg9[%c1, %c0_13, %c0_14] : memref<18x16x128xbf16, #tpu.memory_space<vmem>>, vector<16x16x128xbf16>
    tpu.vector_store %arg9[%c1, %c0_13, %c0_14], %17 {strides = array<i32>} : memref<18x16x128xbf16, #tpu.memory_space<vmem>>, vector<16x16x128xbf16>,
    %c0_15 = arith.constant 0 : index
    %c0_16 = arith.constant 0 : index
    %c0_17 = arith.constant 0 : index
    %19 = vector.load %arg9[%c0_15, %c0_16, %c0_17] : memref<18x16x128xbf16, #tpu.memory_space<vmem>>, vector<16x16x128xbf16>
    %20 = vector.shape_cast %19 : vector<16x16x128xbf16> to vector<256x128xbf16>
    %c1_18 = arith.constant 1 : index
    %c0_19 = arith.constant 0 : index
    %c0_20 = arith.constant 0 : index
    %21 = vector.load %arg9[%c1_18, %c0_19, %c0_20] : memref<18x16x128xbf16, #tpu.memory_space<vmem>>, vector<16x16x128xbf16>
    %22 = vector.shape_cast %21 : vector<16x16x128xbf16> to vector<256x128xbf16>
    %c2 = arith.constant 2 : index
    %c0_21 = arith.constant 0 : index
    %c0_22 = arith.constant 0 : index
    %23 = vector.load %arg9[%c2, %c0_21, %c0_22] : memref<18x16x128xbf16, #tpu.memory_space<vmem>>, vector<16x16x128xbf16>
    %24 = vector.shape_cast %23 : vector<16x16x128xbf16> to vector<256x128xbf16>
    %25 = tpu.concatenate %20, %22, %24 in 1 : vector<256x128xbf16>, vector<256x128xbf16>, vector<256x128xbf16> -> vector<256x384xbf16>
    %c0_23 = arith.constant 0 : index
    %c0_24 = arith.constant 0 : index
    %26 = vector.load %arg5[%c0_23, %c0_24] : memref<1x256xf32, #tpu.memory_space<vmem>>, vector<1x256xf32>
    %c0_25 = arith.constant 0 : index
    %c0_26 = arith.constant 0 : index
    %27 = vector.load %arg4[%c0_25, %c0_26] : memref<384x256xbf16, #tpu.memory_space<vmem>>, vector<384x256xbf16>
    %cst_27 = arith.constant dense<0.000000e+00> : vector<256x256xf32>
    %28 = tpu.matmul %25, %27, %cst_27 {dimension_numbers = #tpu.dot_dimension_numbers<[1], [0], [0], [1], [0, 0, 1, 1], [], []>} : vector<256x384xbf16>, vector<384x256xbf16>, vector<256x256xf32> -> vector<256x256xf32>
    %29 = vector.broadcast %26 : vector<1x256xf32> to vector<256x256xf32>
    %30 = arith.addf %29, %28 : vector<256x256xf32>
    %cst_28 = arith.constant 0.000000e+00 : f32
    %31 = vector.broadcast %cst_28 : f32 to vector<256x256xf32>
    %32 = arith.maximumf %30, %31 : vector<256x256xf32>
    %33 = vector.shape_cast %32 : vector<256x256xf32> to vector<16x16x256xf32>
    %cst_29 = arith.constant dense<0.000000e+00> : vector<16x256xf32>
    %34 = vector.multi_reduction <add>, %33, %cst_29 [0] : vector<16x16x256xf32> to vector<16x256xf32>
    %35 = arith.truncf %34 : vector<16x256xf32> to vector<16x256xbf16>
    %c0_30 = arith.constant 0 : index
    %c0_31 = arith.constant 0 : index
    %36 = vector.load %arg6[%c0_30, %c0_31] : memref<256x128xbf16, #tpu.memory_space<vmem>>, vector<256x128xbf16>
    %cst_32 = arith.constant dense<0.000000e+00> : vector<16x128xf32>
    %37 = tpu.matmul %35, %36, %cst_32 {dimension_numbers = #tpu.dot_dimension_numbers<[1], [0], [0], [1], [0, 0, 1, 1], [], []>} : vector<16x256xbf16>, vector<256x128xbf16>, vector<16x128xf32> -> vector<16x128xf32>
    %c0_33 = arith.constant 0 : index
    %c0_34 = arith.constant 0 : index
    %38 = vector.load %arg7[%c0_33, %c0_34] : memref<1x128xf32, #tpu.memory_space<vmem>>, vector<1x128xf32>
    %39 = vector.broadcast %38 : vector<1x128xf32> to vector<16x128xf32>
    %40 = arith.addf %37, %39 : vector<16x128xf32>
    %c0_35 = arith.constant 0 : index
    %c0_36 = arith.constant 0 : index
    %41 = vector.load %arg8[%c0_35, %c0_36] : memref<16x128xf32, #tpu.memory_space<vmem>>, vector<16x128xf32>
    tpu.vector_store %arg8[%c0_35, %c0_36], %40 {strides = array<i32>} : memref<16x128xf32, #tpu.memory_space<vmem>>, vector<16x128xf32>,
    return
  }
  func.func @transform_0(%arg0: i32) -> (i32, i32, i32) {
    %c0_i32 = arith.constant 0 : i32
    %c0_i32_0 = arith.constant 0 : i32
    %c0_i32_1 = arith.constant 0 : i32
    return %c0_i32, %arg0, %c0_i32_0 : i32, i32, i32
  }
  func.func @transform_1(%arg0: i32) -> (i32, i32) {
    %c0_i32 = arith.constant 0 : i32
    %c0_i32_0 = arith.constant 0 : i32
    %c0_i32_1 = arith.constant 0 : i32
    return %c0_i32, %c0_i32_0 : i32, i32
  }
  func.func @transform_2(%arg0: i32) -> (i32, i32) {
    %c0_i32 = arith.constant 0 : i32
    %c0_i32_0 = arith.constant 0 : i32
    %c0_i32_1 = arith.constant 0 : i32
    return %c0_i32, %c0_i32_0 : i32, i32
  }
  func.func @transform_3(%arg0: i32) -> (i32, i32) {
    %c0_i32 = arith.constant 0 : i32
    %c0_i32_0 = arith.constant 0 : i32
    %c0_i32_1 = arith.constant 0 : i32
    return %c0_i32, %c0_i32_0 : i32, i32
  }
  func.func @transform_4(%arg0: i32) -> (i32, i32) {
    %c0_i32 = arith.constant 0 : i32
    %c0_i32_0 = arith.constant 0 : i32
    %c0_i32_1 = arith.constant 0 : i32
    return %c0_i32, %c0_i32_0 : i32, i32
  }
  func.func @transform_5(%arg0: i32) -> (i32, i32) {
    %c0_i32 = arith.constant 0 : i32
    %c0_i32_0 = arith.constant 0 : i32
    %c0_i32_1 = arith.constant 0 : i32
    return %c0_i32, %c0_i32_0 : i32, i32
  }
  func.func @transform_6(%arg0: i32) -> (i32, i32) {
    %c0_i32 = arith.constant 0 : i32
    %c0_i32_0 = arith.constant 0 : i32
    %c0_i32_1 = arith.constant 0 : i32
    return %c0_i32, %c0_i32_0 : i32, i32
  }
  func.func @transform_7(%arg0: i32) -> (i32, i32) {
    %c0_i32 = arith.constant 0 : i32
    %c0_i32_0 = arith.constant 0 : i32
    return %arg0, %c0_i32 : i32, i32
  }
}

</mosaic_0001>

<bundles_post_ra>
// kernel: tile.23
= control target key start
LH: loop header
LB: loop body
LE: loop exit
PB: predicated region body
PF: predicated region fallthrough
CT: control target
= control target key end

     0   :  { %s28_s0 = inlined_call_operand.vmem [shape: f32[16], index: 0, kind: input, shape index: {}]   ;;  %s29_s1 = inlined_call_operand.vmem [shape: f32[16,16], index: 1, kind: output, shape index: {}]  }
   0x1   :  { %v4_v0 = vld [vmem:[%s28_s0] ss:$0 sm:$0xff] }
   0x2   :  { %5 = vst [vmem:[%s29_s1] sm:$0xff] %v4_v0  ;;  %8 = vst [vmem:[%s29_s1 + $0x8] sm:$0xff] %v4_v0 }

// kernel: tile.24
= control target key start
LH: loop header
LB: loop body
LE: loop exit
PB: predicated region body
PF: predicated region fallthrough
CT: control target
= control target key end

     0   :  { %s7_s6 = smov 3  ;;  %s21_s9 = smov 3  ;;  %vm4_vm0 = vcmask 130048   ;;  %vm11_vm1 = vcmask 1048448   ;;  %vm18_vm2 = vcmask 917248   ;;  %vm25_vm3 = vcmask 786048   ;;  %s128_s0 = inlined_call_operand.vmem [shape: f32[16,16], index: 0, kind: input, shape index: {}]   ;;  %s129_s1 = inlined_call_operand.vmem [shape: f32[1,256], index: 1, kind: output, shape index: {}]  }
   0x1   :  { %v66_v0 = vld [vmem:[%s128_s0 + $0x7] ss:$8 sm:%s7_s6]   ;;  %s81_s10 = smov 112   ;;  %v68_v1 = vld [vmem:[%s128_s0 + $0x5] ss:$8 sm:%s21_s9]   ;;  %s14_s13 = smov 3 }
   0x2   :  { %9 = vrot.lane.b32.xlu0 %v66_v0, %s81_s10  ;;  %s82_s14 = smov 80   ;;  %v67_v2 = vld [vmem:[%s128_s0 + $0x6] ss:$8 sm:%s14_s13]   ;;  %s28_s17 = smov 3  ;;  %vm32_vm4 = vcmask 654848   ;;  %vm39_vm5 = vcmask 523648  }
   0x3   :  { %23 = vrot.lane.b32.xlu1 %v68_v1, %s82_s14  ;;  %v69_v3 = vld [vmem:[%s128_s0 + $0x4] ss:$8 sm:%s28_s17]   ;;  %s35_s20 = smov 3  ;;  %s42_s21 = smov 3  ;;  %vm46_vm6 = vcmask 392448   ;;  %vm53_vm7 = vcmask 261248  }
   0x4   :  { %s83_s22 = smov 96   ;;  %s84_s23 = smov 64   ;;  %v70_v4 = vld [vmem:[%s128_s0 + $0x3] ss:$8 sm:%s35_s20]   ;;  %v71_v5 = vld [vmem:[%s128_s0 + $0x2] ss:$8 sm:%s42_s21]  }
   0x5   :  { %s2_s26 = smov 3  ;;  %s49_s29 = smov 3 }
   0x6   :  { %16 = vrot.lane.b32.xlu0 %v67_v2, %s83_s22  ;;  %v3_v6 = vld [vmem:[%s128_s0] ss:$8 sm:%s2_s26]   ;;  %s85_s3 = smov 48   ;;  %s86_s4 = smov 32  }
   0x7   :  { %30 = vrot.lane.b32.xlu1 %v69_v3, %s84_s23  ;;  %5 = vst.msk [vmem:[#allocation0] ss:$8 sm:$0x3] %vm4_vm0, %v3_v6   ;;  %v72_v7 = vld [vmem:[%s128_s0 + $0x1] ss:$8 sm:%s49_s29]   ;;  %s87_s0 = smov 16  }
   0xa   :  { %37 = vrot.lane.b32.xlu0 %v70_v4, %s85_s3 }
   0xb   :  { %44 = vrot.lane.b32.xlu1 %v71_v5, %s86_s4 }
   0xe   :  { %51 = vrot.lane.b32.xlu0 %v72_v7, %s87_s0 }
  0x74   :  { %v10_v8 = vpop.permute.xlu0 %9  }
  0x75   :  { %12 = vst.msk [vmem:[#allocation0] ss:$8 sm:$0x3] %vm11_vm1, %v10_v8   ;;  %v24_v9 = vpop.permute.xlu1 %23  }
  0x78   :  { %v17_v10 = vpop.permute.xlu0 %16  }
  0x79   :  { %19 = vst.msk [vmem:[#allocation0] ss:$8 sm:$0x3] %vm18_vm2, %v17_v10   ;;  %v31_v11 = vpop.permute.xlu1 %30  }
  0x7a   :  { %26 = vst.msk [vmem:[#allocation0] ss:$8 sm:$0x3] %vm25_vm3, %v24_v9  }
  0x7b   :  { %33 = vst.msk [vmem:[#allocation0] ss:$8 sm:$0x3] %vm32_vm4, %v31_v11  }
  0x7c   :  { %v38_v12 = vpop.permute.xlu0 %37  }
  0x7d   :  { %40 = vst.msk [vmem:[#allocation0] ss:$8 sm:$0x3] %vm39_vm5, %v38_v12   ;;  %v45_v13 = vpop.permute.xlu1 %44  }
  0x7e   :  { %47 = vst.msk [vmem:[#allocation0] ss:$8 sm:$0x3] %vm46_vm6, %v45_v13  }
  0x80   :  { %v52_v14 = vpop.permute.xlu0 %51  }
  0x81   :  { %54 = vst.msk [vmem:[#allocation0] ss:$8 sm:$0x3] %vm53_vm7, %v52_v14  }
  0x88   :  { %v58_v15 = vld [vmem:[#allocation0] sm:$0x1]  ;;  %v62_v16 = vld [vmem:[#allocation0 + $0x8] sm:$0x1] }
  0x89   :  { %60 = vst [vmem:[%s129_s1] sm:$0x1] %v58_v15  ;;  %73 = vst [vmem:[%s129_s1 + $0x1] sm:$0x1] %v62_v16 }

// kernel: tile.18
= control target key start
LH: loop header
LB: loop body
LE: loop exit
PB: predicated region body
PF: predicated region fallthrough
CT: control target
= control target key end

     0   :  { %s28_s0 = inlined_call_operand.vmem [shape: f32[8], index: 0, kind: input, shape index: {}]   ;;  %s29_s1 = inlined_call_operand.vmem [shape: f32[16,8], index: 1, kind: output, shape index: {}]  }
   0x1   :  { %v4_v0 = vld [vmem:[%s28_s0] ss:$0 sm:$0xff] }
   0x2   :  { %5 = vst [vmem:[%s29_s1] sm:$0xff] %v4_v0  ;;  %8 = vst [vmem:[%s29_s1 + $0x8] sm:$0xff] %v4_v0 }

// kernel: tile.19
= control target key start
LH: loop header
LB: loop body
LE: loop exit
PB: predicated region body
PF: predicated region fallthrough
CT: control target
= control target key end

     0   :  { %s131_s10 = smov 120   ;;  %s132_s11 = smov 104   ;;  %vm3_vm0 = vcmask 64512   ;;  %vm9_vm1 = vcmask 1048512   ;;  %vm15_vm2 = vcmask 982912   ;;  %vm21_vm3 = vcmask 917312   ;;  %s207_s0 = inlined_call_operand.vmem [shape: f32[16,8], index: 0, kind: input, shape index: {}]   ;;  %s208_s1 = inlined_call_operand.vmem [shape: f32[1,128], index: 1, kind: output, shape index: {}]  }
   0x1   :  { %v101_v0 = vld [vmem:[%s207_s0 + $0xf] sm:$0x1]   ;;  %v103_v1 = vld [vmem:[%s207_s0 + $0xd] sm:$0x1]   ;;  %v102_v2 = vld [vmem:[%s207_s0 + $0xe] sm:$0x1]  }
   0x2   :  { %7 = vrot.lane.b32.xlu0 %v101_v0, %s131_s10  ;;  %19 = vrot.lane.b32.xlu1 %v103_v1, %s132_s11  ;;  %v104_v3 = vld [vmem:[%s207_s0 + $0xc] sm:$0x1]   ;;  %s133_s16 = smov 112   ;;  %s134_s17 = smov 96   ;;  %v105_v4 = vld [vmem:[%s207_s0 + $0xb] sm:$0x1]  }
   0x3   :  { %v106_v5 = vld [vmem:[%s207_s0 + $0xa] sm:$0x1]   ;;  %v2_v6 = vld [vmem:[%s207_s0] sm:$0x1]   ;;  %s135_s24 = smov 88   ;;  %s136_s25 = smov 80  }
   0x4   :  { %4 = vst.msk [vmem:[#allocation0] sm:$0x1] %vm3_vm0, %v2_v6   ;;  %v107_v7 = vld [vmem:[%s207_s0 + $0x9] sm:$0x1]   ;;  %v108_v8 = vld [vmem:[%s207_s0 + $0x8] sm:$0x1]  }
   0x5   :  { %s137_s30 = smov 72   ;;  %s138_s2 = smov 64   ;;  %v109_v9 = vld [vmem:[%s207_s0 + $0x7] sm:$0x1]   ;;  %v110_v10 = vld [vmem:[%s207_s0 + $0x6] sm:$0x1]  }
   0x6   :  { %13 = vrot.lane.b32.xlu0 %v102_v2, %s133_s16  ;;  %25 = vrot.lane.b32.xlu1 %v104_v3, %s134_s17  ;;  %s139_s7 = smov 56   ;;  %s140_s8 = smov 48   ;;  %v111_v11 = vld [vmem:[%s207_s0 + $0x5] sm:$0x1]   ;;  %v112_v12 = vld [vmem:[%s207_s0 + $0x4] sm:$0x1]  }
   0x7   :  { %s141_s13 = smov 40   ;;  %s142_s14 = smov 32   ;;  %v113_v13 = vld [vmem:[%s207_s0 + $0x3] sm:$0x1]   ;;  %v114_v14 = vld [vmem:[%s207_s0 + $0x2] sm:$0x1]  }
   0x8   :  { %s143_s19 = smov 24   ;;  %s144_s20 = smov 16   ;;  %v115_v15 = vld [vmem:[%s207_s0 + $0x1] sm:$0x1]   ;;  %vm27_vm4 = vcmask 851712   ;;  %vm33_vm5 = vcmask 786112  }
   0x9   :  { %s145_s0 = smov 8   ;;  %vm39_vm6 = vcmask 720512   ;;  %vm45_vm7 = vcmask 654912   ;;  %vm51_vm8 = vcmask 589312   ;;  %vm57_vm9 = vcmask 523712  }
   0xa   :  { %31 = vrot.lane.b32.xlu0 %v105_v4, %s135_s24  ;;  %37 = vrot.lane.b32.xlu1 %v106_v5, %s136_s25  ;;  %vm63_vm10 = vcmask 458112   ;;  %vm69_vm11 = vcmask 392512   ;;  %vm75_vm12 = vcmask 326912   ;;  %vm81_vm13 = vcmask 261312  }
   0xb   :  { %vm87_vm14 = vcmask 195712   ;;  %vm93_vm15 = vcmask 130112  }
   0xe   :  { %43 = vrot.lane.b32.xlu0 %v107_v7, %s137_s30  ;;  %49 = vrot.lane.b32.xlu1 %v108_v8, %s138_s2 }
  0x12   :  { %55 = vrot.lane.b32.xlu0 %v109_v9, %s139_s7  ;;  %61 = vrot.lane.b32.xlu1 %v110_v10, %s140_s8 }
  0x16   :  { %67 = vrot.lane.b32.xlu0 %v111_v11, %s141_s13  ;;  %73 = vrot.lane.b32.xlu1 %v112_v12, %s142_s14 }
  0x1a   :  { %79 = vrot.lane.b32.xlu0 %v113_v13, %s143_s19  ;;  %85 = vrot.lane.b32.xlu1 %v114_v14, %s144_s20 }
  0x1e   :  { %91 = vrot.lane.b32.xlu0 %v115_v15, %s145_s0 }
  0x74   :  { %v8_v16 = vpop.permute.xlu0 %7   ;;  %v20_v17 = vpop.permute.xlu1 %19  }
  0x75   :  { %10 = vst.msk [vmem:[#allocation0] sm:$0x1] %vm9_vm1, %v8_v16  }
  0x78   :  { %v14_v18 = vpop.permute.xlu0 %13   ;;  %v26_v19 = vpop.permute.xlu1 %25  }
  0x79   :  { %16 = vst.msk [vmem:[#allocation0] sm:$0x1] %vm15_vm2, %v14_v18  }
  0x7a   :  { %22 = vst.msk [vmem:[#allocation0] sm:$0x1] %vm21_vm3, %v20_v17  }
  0x7b   :  { %28 = vst.msk [vmem:[#allocation0] sm:$0x1] %vm27_vm4, %v26_v19  }
  0x7c   :  { %v32_v20 = vpop.permute.xlu0 %31   ;;  %v38_v21 = vpop.permute.xlu1 %37  }
  0x7d   :  { %34 = vst.msk [vmem:[#allocation0] sm:$0x1] %vm33_vm5, %v32_v20  }
  0x7e   :  { %40 = vst.msk [vmem:[#allocation0] sm:$0x1] %vm39_vm6, %v38_v21  }
  0x80   :  { %v44_v22 = vpop.permute.xlu0 %43   ;;  %v50_v23 = vpop.permute.xlu1 %49  }
  0x81   :  { %46 = vst.msk [vmem:[#allocation0] sm:$0x1] %vm45_vm7, %v44_v22  }
  0x82   :  { %52 = vst.msk [vmem:[#allocation0] sm:$0x1] %vm51_vm8, %v50_v23  }
  0x84   :  { %v56_v24 = vpop.permute.xlu0 %55   ;;  %v62_v25 = vpop.permute.xlu1 %61  }
  0x85   :  { %58 = vst.msk [vmem:[#allocation0] sm:$0x1] %vm57_vm9, %v56_v24  }
  0x86   :  { %64 = vst.msk [vmem:[#allocation0] sm:$0x1] %vm63_vm10, %v62_v25  }
  0x88   :  { %v68_v26 = vpop.permute.xlu0 %67   ;;  %v74_v27 = vpop.permute.xlu1 %73  }
  0x89   :  { %70 = vst.msk [vmem:[#allocation0] sm:$0x1] %vm69_vm11, %v68_v26  }
  0x8a   :  { %76 = vst.msk [vmem:[#allocation0] sm:$0x1] %vm75_vm12, %v74_v27  }
  0x8c   :  { %v80_v28 = vpop.permute.xlu0 %79   ;;  %v86_v29 = vpop.permute.xlu1 %85  }
  0x8d   :  { %82 = vst.msk [vmem:[#allocation0] sm:$0x1] %vm81_vm13, %v80_v28  }
  0x8e   :  { %88 = vst.msk [vmem:[#allocation0] sm:$0x1] %vm87_vm14, %v86_v29  }
  0x90   :  { %v92_v30 = vpop.permute.xlu0 %91  }
  0x91   :  { %94 = vst.msk [vmem:[#allocation0] sm:$0x1] %vm93_vm15, %v92_v30  }
  0x98   :  { %v98_v31 = vld [vmem:[#allocation0] sm:$0x1] }
  0x99   :  { %100 = vst [vmem:[%s208_s1] sm:$0x1] %v98_v31 }

// kernel: uncoiler_forward.1
= control target key start
LH: loop header
LB: loop body
LE: loop exit
PB: predicated region body
PF: predicated region fallthrough
CT: control target
= control target key end

     0   :  { %v2084_v0 = vmov 0   ;;  %vm306_vm0 = vcmask 523264   ;;  %s2768_s1 = inlined_call_operand.vmem [shape: bf16[192,128], index: 1, kind: input, shape index: {}]   ;;  %s2769_s0 = inlined_call_operand.vmem [shape: bf16[16,16,192], index: 0, kind: input, shape index: {}]   ;;  %s2770_s3 = inlined_call_operand.vmem [shape: bf16[384,256], index: 3, kind: input, shape index: {}]   ;;  %s2771_s2 = inlined_call_operand.vmem [shape: f32[1,128], index: 2, kind: input, shape index: {}]   ;;  %s2772_s5 = inlined_call_operand.vmem [shape: bf16[256,128], index: 5, kind: input, shape index: {}]   ;;  %s2773_s4 = inlined_call_operand.vmem [shape: f32[1,256], index: 4, kind: input, shape index: {}]   ;;  %s2774_s6 = inlined_call_operand.vmem [shape: f32[1,128], index: 6, kind: input, shape index: {}]   ;;  %s2775_s7 = inlined_call_operand.vmem [shape: f32[16,128], index: 7, kind: output, shape index: {}]  }
   0x1   :  { %355 = vmatprep.subr.bf16.mxu0 %v2084_v0  ;;  %v1936_v1 = vld [vmem:[%s2768_s1] sm:$0xff]   ;;  %v1937_v2 = vld [vmem:[%s2768_s1 + $0x8] sm:$0xff]   ;;  %v1938_v3 = vld [vmem:[%s2768_s1 + $0x10] sm:$0xff]  }
   0x2   :  { %356 = vmatpush1.bf16.msra.mxu0 %v1936_v1  ;;  %v1939_v4 = vld [vmem:[%s2768_s1 + $0x18] sm:$0xff]   ;;  %v1950_v5 = vld [vmem:[%s2769_s0 + $0x4] ss:$8 sps:$4 sm:$0xff]   ;;  %v1942_v8 = vld [vmem:[%s2768_s1 + $0x30] sm:$0xff]  }
   0x3   :  { %357 = vmatprep.subr.bf16.mxu0 %v2084_v0  ;;  %v1940_v6 = vld [vmem:[%s2768_s1 + $0x20] sm:$0xff]   ;;  %1736 = vmatprep.mubr.msk.bf16.mxu0 %vm306_vm0, %v1950_v5  ;;  %v1941_v7 = vld [vmem:[%s2768_s1 + $0x28] sm:$0xff]   ;;  %v1943_v9 = vld [vmem:[%s2768_s1 + $0x38] sm:$0xff]  }
   0x4   :  { %v1944_v10 = vld [vmem:[%s2768_s1 + $0x40] sm:$0xff]   ;;  %v1945_v11 = vld [vmem:[%s2768_s1 + $0x48] sm:$0xff]   ;;  %v1946_v12 = vld [vmem:[%s2768_s1 + $0x50] sm:$0xff]  }
   0x5   :  { %v1947_v13 = vld [vmem:[%s2768_s1 + $0x58] sm:$0xff]   ;;  %v1998_v14 = vld [vmem:[%s2770_s3 + $0x4] ss:$8 sps:$4 sm:$0xff]   ;;  %v1996_v15 = vld [vmem:[%s2770_s3] ss:$8 sps:$4 sm:$0xff]  }
   0x6   :  { %358 = vmatpush1.bf16.msra.mxu0 %v1937_v2  ;;  %v1948_v16 = vld [vmem:[%s2769_s0] ss:$8 sps:$4 sm:$0xff]   ;;  %v2001_v17 = vld [vmem:[%s2770_s3 + $0x14] ss:$8 sps:$4 sm:$0xff]   ;;  %1839 = vmatprep.subr.bf16.mxu1 %v1998_v14  ;;  %v1999_v19 = vld [vmem:[%s2770_s3 + $0x10] ss:$8 sps:$4 sm:$0xff]  }
   0x7   :  { %359 = vmatprep.subr.bf16.mxu0 %v2084_v0  ;;  %v1951_v18 = vld [vmem:[%s2769_s0 + $0x14] ss:$8 sps:$4 sm:$0xff]   ;;  %1855 = vmatpush1.bf16.msra.mxu1 %v1996_v15  ;;  %v2004_v20 = vld [vmem:[%s2770_s3 + $0x24] ss:$8 sps:$4 sm:$0xff]   ;;  %v1953_v21 = vld [vmem:[%s2769_s0 + $0x10] ss:$8 sps:$4 sm:$0xff]  }
   0x8   :  { %1840 = vmatprep.subr.bf16.mxu1 %v2001_v17  ;;  %v1954_v22 = vld [vmem:[%s2769_s0 + $0x24] ss:$8 sps:$4 sm:$0xff]   ;;  %v2002_v23 = vld [vmem:[%s2770_s3 + $0x20] ss:$8 sps:$4 sm:$0xff]   ;;  %v2007_v24 = vld [vmem:[%s2770_s3 + $0x34] ss:$8 sps:$4 sm:$0xff]  }
   0x9   :  { %v2005_v25 = vld [vmem:[%s2770_s3 + $0x30] ss:$8 sps:$4 sm:$0xff]   ;;  %v2010_v26 = vld [vmem:[%s2770_s3 + $0x44] ss:$8 sps:$4 sm:$0xff]   ;;  %v1956_v27 = vld [vmem:[%s2769_s0 + $0x20] ss:$8 sps:$4 sm:$0xff]  }
   0xa   :  { %360 = vmatpush1.bf16.msra.mxu0 %v1938_v3  ;;  %v1957_v28 = vld [vmem:[%s2769_s0 + $0x34] ss:$8 sps:$4 sm:$0xff]   ;;  %v2008_v29 = vld [vmem:[%s2770_s3 + $0x40] ss:$8 sps:$4 sm:$0xff]   ;;  %v2011_v31 = vld [vmem:[%s2770_s3 + $0x50] ss:$8 sps:$4 sm:$0xff]  }
   0xb   :  { %361 = vmatprep.subr.bf16.mxu0 %v2084_v0  ;;  %1856 = vmatpush1.bf16.msra.mxu1 %v1999_v19  ;;  %v2013_v30 = vld [vmem:[%s2770_s3 + $0x54] ss:$8 sps:$4 sm:$0xff]   ;;  %v2016_v32 = vld [vmem:[%s2770_s3 + $0x64] ss:$8 sps:$4 sm:$0xff]   ;;  %v1959_v33 = vld [vmem:[%s2769_s0 + $0x30] ss:$8 sps:$4 sm:$0xff]  }
   0xc   :  { %1841 = vmatprep.subr.bf16.mxu1 %v2004_v20  ;;  %v2014_v34 = vld [vmem:[%s2770_s3 + $0x60] ss:$8 sps:$4 sm:$0xff]   ;;  %v1960_v35 = vld [vmem:[%s2769_s0 + $0x44] ss:$8 sps:$4 sm:$0xff]   ;;  %v2019_v36 = vld [vmem:[%s2770_s3 + $0x74] ss:$8 sps:$4 sm:$0xff]  }
   0xd   :  { %v2017_v37 = vld [vmem:[%s2770_s3 + $0x70] ss:$8 sps:$4 sm:$0xff]   ;;  %v2022_v38 = vld [vmem:[%s2770_s3 + $0x84] ss:$8 sps:$4 sm:$0xff]   ;;  %v1962_v39 = vld [vmem:[%s2769_s0 + $0x40] ss:$8 sps:$4 sm:$0xff]  }
   0xe   :  { %362 = vmatpush1.bf16.msra.mxu0 %v1939_v4  ;;  %v2020_v40 = vld [vmem:[%s2770_s3 + $0x80] ss:$8 sps:$4 sm:$0xff]   ;;  %v1963_v41 = vld [vmem:[%s2769_s0 + $0x54] ss:$8 sps:$4 sm:$0xff]   ;;  %v2023_v43 = vld [vmem:[%s2770_s3 + $0x90] ss:$8 sps:$4 sm:$0xff]  }
   0xf   :  { %363 = vmatprep.subr.bf16.mxu0 %v2084_v0  ;;  %1857 = vmatpush1.bf16.msra.mxu1 %v2002_v23  ;;  %v2025_v42 = vld [vmem:[%s2770_s3 + $0x94] ss:$8 sps:$4 sm:$0xff]   ;;  %v2028_v44 = vld [vmem:[%s2770_s3 + $0xa4] ss:$8 sps:$4 sm:$0xff]   ;;  %v1965_v45 = vld [vmem:[%s2769_s0 + $0x50] ss:$8 sps:$4 sm:$0xff]  }
  0x10   :  { %1842 = vmatprep.subr.bf16.mxu1 %v2007_v24  ;;  %v2026_v46 = vld [vmem:[%s2770_s3 + $0xa0] ss:$8 sps:$4 sm:$0xff]   ;;  %v1966_v47 = vld [vmem:[%s2769_s0 + $0x64] ss:$8 sps:$4 sm:$0xff]   ;;  %v2031_v48 = vld [vmem:[%s2770_s3 + $0xb4] ss:$8 sps:$4 sm:$0xff]  }
  0x11   :  { %v2029_v49 = vld [vmem:[%s2770_s3 + $0xb0] ss:$8 sps:$4 sm:$0xff]   ;;  %v2034_v50 = vld [vmem:[%s2770_s3 + $0xc4] ss:$8 sps:$4 sm:$0xff]   ;;  %v1968_v51 = vld [vmem:[%s2769_s0 + $0x60] ss:$8 sps:$4 sm:$0xff]  }
  0x12   :  { %364 = vmatpush1.bf16.msra.mxu0 %v1940_v6  ;;  %v2032_v52 = vld [vmem:[%s2770_s3 + $0xc0] ss:$8 sps:$4 sm:$0xff]   ;;  %v1969_v53 = vld [vmem:[%s2769_s0 + $0x74] ss:$8 sps:$4 sm:$0xff]   ;;  %v2035_v55 = vld [vmem:[%s2770_s3 + $0xd0] ss:$8 sps:$4 sm:$0xff]  }
  0x13   :  { %365 = vmatprep.subr.bf16.mxu0 %v2084_v0  ;;  %1858 = vmatpush1.bf16.msra.mxu1 %v2005_v25  ;;  %v2037_v54 = vld [vmem:[%s2770_s3 + $0xd4] ss:$8 sps:$4 sm:$0xff]   ;;  %v1971_v56 = vld [vmem:[%s2769_s0 + $0x70] ss:$8 sps:$4 sm:$0xff]   ;;  %v1972_v57 = vld [vmem:[%s2769_s0 + $0x84] ss:$8 sps:$4 sm:$0xff]  }
  0x14   :  { %1843 = vmatprep.subr.bf16.mxu1 %v2010_v26  ;;  %v1974_v58 = vld [vmem:[%s2769_s0 + $0x80] ss:$8 sps:$4 sm:$0xff]   ;;  %v1975_v59 = vld [vmem:[%s2769_s0 + $0x94] ss:$8 sps:$4 sm:$0xff]   ;;  %v1977_v60 = vld [vmem:[%s2769_s0 + $0x90] ss:$8 sps:$4 sm:$0xff]  }
  0x15   :  { %v1978_v61 = vld [vmem:[%s2769_s0 + $0xa4] ss:$8 sps:$4 sm:$0xff]   ;;  %v1980_v62 = vld [vmem:[%s2769_s0 + $0xa0] ss:$8 sps:$4 sm:$0xff]   ;;  %v1981_v63 = vld [vmem:[%s2769_s0 + $0xb4] ss:$8 sps:$4 sm:$0xff]  }
  0x16   :  { %366 = vmatpush1.bf16.msra.mxu0 %v1941_v7  ;;  %v2040_v1 = vld [vmem:[%s2770_s3 + $0xe4] ss:$8 sps:$4 sm:$0xff]   ;;  %v1983_v2 = vld [vmem:[%s2769_s0 + $0xb0] ss:$8 sps:$4 sm:$0xff]   ;;  %v2038_v3 = vld [vmem:[%s2770_s3 + $0xe0] ss:$8 sps:$4 sm:$0xff]  }
  0x17   :  { %367 = vmatprep.subr.bf16.mxu0 %v2084_v0  ;;  %1859 = vmatpush1.bf16.msra.mxu1 %v2008_v29  ;;  %v1984_v4 = vld [vmem:[%s2769_s0 + $0xc4] ss:$8 sps:$4 sm:$0xff]   ;;  %v2043_v5 = vld [vmem:[%s2770_s3 + $0xf4] ss:$8 sps:$4 sm:$0xff]   ;;  %v2041_v6 = vld [vmem:[%s2770_s3 + $0xf0] ss:$8 sps:$4 sm:$0xff]  }
  0x18   :  { %1844 = vmatprep.subr.bf16.mxu1 %v2013_v30  ;;  %v1986_v7 = vld [vmem:[%s2769_s0 + $0xc0] ss:$8 sps:$4 sm:$0xff]  }
  0x1a   :  { %368 = vmatpush1.bf16.msra.mxu0 %v1942_v8  ;;  %v1987_v8 = vld [vmem:[%s2769_s0 + $0xd4] ss:$8 sps:$4 sm:$0xff]  }
  0x1b   :  { %369 = vmatprep.subr.bf16.mxu0 %v2084_v0  ;;  %1860 = vmatpush1.bf16.msra.mxu1 %v2011_v31 }
  0x1c   :  { %1845 = vmatprep.subr.bf16.mxu1 %v2016_v32 }
  0x1e   :  { %370 = vmatpush1.bf16.msra.mxu0 %v1943_v9  ;;  %v1989_v9 = vld [vmem:[%s2769_s0 + $0xd0] ss:$8 sps:$4 sm:$0xff]  }
  0x1f   :  { %371 = vmatprep.subr.bf16.mxu0 %v2084_v0  ;;  %1861 = vmatpush1.bf16.msra.mxu1 %v2014_v34 }
  0x20   :  { %1846 = vmatprep.subr.bf16.mxu1 %v2019_v36 }
  0x22   :  { %372 = vmatpush1.bf16.msra.mxu0 %v1944_v10  ;;  %v1990_v10 = vld [vmem:[%s2769_s0 + $0xe4] ss:$8 sps:$4 sm:$0xff]  }
  0x23   :  { %373 = vmatprep.subr.bf16.mxu0 %v2084_v0  ;;  %1862 = vmatpush1.bf16.msra.mxu1 %v2017_v37 }
  0x24   :  { %1847 = vmatprep.subr.bf16.mxu1 %v2022_v38 }
  0x26   :  { %374 = vmatpush1.bf16.msra.mxu0 %v1945_v11  ;;  %v1992_v11 = vld [vmem:[%s2769_s0 + $0xe0] ss:$8 sps:$4 sm:$0xff]  }
  0x27   :  { %375 = vmatprep.subr.bf16.mxu0 %v2084_v0  ;;  %1863 = vmatpush1.bf16.msra.mxu1 %v2020_v40 }
  0x28   :  { %1848 = vmatprep.subr.bf16.mxu1 %v2025_v42 }
  0x2a   :  { %376 = vmatpush1.bf16.msra.mxu0 %v1946_v12  ;;  %v1993_v12 = vld [vmem:[%s2769_s0 + $0xf4] ss:$8 sps:$4 sm:$0xff]  }
  0x2b   :  { %377 = vmatprep.subr.bf16.mxu0 %v2084_v0  ;;  %1864 = vmatpush1.bf16.msra.mxu1 %v2023_v43 }
  0x2c   :  { %1849 = vmatprep.subr.bf16.mxu1 %v2028_v44 }
  0x2e   :  { %378 = vmatpush1.bf16.msra.mxu0 %v1947_v13  ;;  %v1995_v13 = vld [vmem:[%s2769_s0 + $0xf0] ss:$8 sps:$4 sm:$0xff]  }
  0x2f   :  { %922 = vmatprep.subr.bf16.mxu0 %v1998_v14  ;;  %1865 = vmatpush1.bf16.msra.mxu1 %v2026_v46  ;;  %v2046_v14 = vld [vmem:[%s2770_s3 + $0x104] ss:$8 sps:$4 sm:$0xff]  }
  0x30   :  { %1850 = vmatprep.subr.bf16.mxu1 %v2031_v48 }
  0x31   :  { %388 = vmatmul.mubr.bf16.vlgmr.msra.gmra.mrb[0].mxu0 %v1948_v16 }
  0x32   :  { %1737 = vmatprep.mubr.msk.bf16.mxu0 %vm306_vm0, %v1951_v18  ;;  %923 = vmatpush1.bf16.msra.mxu0 %v1996_v15  ;;  %v2387_v15 = vld [vmem:[%s2771_s2] ss:$0 sm:$0xff] }
  0x33   :  { %924 = vmatprep.subr.bf16.mxu0 %v2001_v17  ;;  %1866 = vmatpush1.bf16.msra.mxu1 %v2029_v49 }
  0x34   :  { %1851 = vmatprep.subr.bf16.mxu1 %v2034_v50 }
  0x36   :  { %925 = vmatpush1.bf16.msra.mxu0 %v1999_v19 }
  0x37   :  { %926 = vmatprep.subr.bf16.mxu0 %v2004_v20  ;;  %1867 = vmatpush1.bf16.msra.mxu1 %v2032_v52 }
  0x38   :  { %1852 = vmatprep.subr.bf16.mxu1 %v2037_v54 }
  0x39   :  { %396 = vmatmul.mubr.bf16.gmra.mrb[4].mxu0 %v1953_v21 }
  0x3a   :  { %1738 = vmatprep.mubr.msk.bf16.mxu0 %vm306_vm0, %v1954_v22  ;;  %927 = vmatpush1.bf16.msra.mxu0 %v2002_v23 }
  0x3b   :  { %928 = vmatprep.subr.bf16.mxu0 %v2007_v24  ;;  %1868 = vmatpush1.bf16.msra.mxu1 %v2035_v55 }
  0x3c   :  { %1853 = vmatprep.subr.bf16.mxu1 %v2040_v1 }
  0x3e   :  { %929 = vmatpush1.bf16.msra.mxu0 %v2005_v25 }
  0x3f   :  { %930 = vmatprep.subr.bf16.mxu0 %v2010_v26  ;;  %1869 = vmatpush1.bf16.msra.mxu1 %v2038_v3 }
  0x40   :  { %1854 = vmatprep.subr.bf16.mxu1 %v2043_v5 }
  0x41   :  { %404 = vmatmul.mubr.bf16.gmra.mrb[8].mxu0 %v1956_v27 }
  0x42   :  { %1739 = vmatprep.mubr.msk.bf16.mxu0 %vm306_vm0, %v1957_v28  ;;  %931 = vmatpush1.bf16.msra.mxu0 %v2008_v29 }
  0x43   :  { %932 = vmatprep.subr.bf16.mxu0 %v2013_v30  ;;  %1870 = vmatpush1.bf16.msra.mxu1 %v2041_v6 }
  0x44   :  { %1115 = vmatprep.subr.bf16.mxu1 %v2046_v14 }
  0x46   :  { %933 = vmatpush1.bf16.msra.mxu0 %v2011_v31 }
  0x47   :  { %934 = vmatprep.subr.bf16.mxu0 %v2016_v32 }
  0x49   :  { %412 = vmatmul.mubr.bf16.gmra.mrb[12].mxu0 %v1959_v33 }
  0x4a   :  { %1740 = vmatprep.mubr.msk.bf16.mxu0 %vm306_vm0, %v1960_v35  ;;  %935 = vmatpush1.bf16.msra.mxu0 %v2014_v34 }
  0x4b   :  { %936 = vmatprep.subr.bf16.mxu0 %v2019_v36 }
  0x4e   :  { %937 = vmatpush1.bf16.msra.mxu0 %v2017_v37 }
  0x4f   :  { %938 = vmatprep.subr.bf16.mxu0 %v2022_v38 }
  0x51   :  { %420 = vmatmul.mubr.bf16.gmra.mrb[16].mxu0 %v1962_v39 }
  0x52   :  { %1741 = vmatprep.mubr.msk.bf16.mxu0 %vm306_vm0, %v1963_v41  ;;  %939 = vmatpush1.bf16.msra.mxu0 %v2020_v40 }
  0x53   :  { %940 = vmatprep.subr.bf16.mxu0 %v2025_v42 }
  0x56   :  { %941 = vmatpush1.bf16.msra.mxu0 %v2023_v43 }
  0x57   :  { %942 = vmatprep.subr.bf16.mxu0 %v2028_v44 }
  0x59   :  { %428 = vmatmul.mubr.bf16.gmra.mrb[20].mxu0 %v1965_v45 }
  0x5a   :  { %1742 = vmatprep.mubr.msk.bf16.mxu0 %vm306_vm0, %v1966_v47  ;;  %943 = vmatpush1.bf16.msra.mxu0 %v2026_v46 }
  0x5b   :  { %944 = vmatprep.subr.bf16.mxu0 %v2031_v48 }
  0x5e   :  { %945 = vmatpush1.bf16.msra.mxu0 %v2029_v49 }
  0x5f   :  { %946 = vmatprep.subr.bf16.mxu0 %v2034_v50 }
  0x61   :  { %436 = vmatmul.mubr.bf16.gmra.mrb[24].mxu0 %v1968_v51 }
  0x62   :  { %1743 = vmatprep.mubr.msk.bf16.mxu0 %vm306_vm0, %v1969_v53  ;;  %947 = vmatpush1.bf16.msra.mxu0 %v2032_v52 }
  0x63   :  { %948 = vmatprep.subr.bf16.mxu0 %v2037_v54 }
  0x66   :  { %949 = vmatpush1.bf16.msra.mxu0 %v2035_v55 }
  0x67   :  { %950 = vmatprep.subr.bf16.mxu0 %v2040_v1 }
  0x69   :  { %444 = vmatmul.mubr.bf16.gmra.mrb[28].mxu0 %v1971_v56 }
  0x6a   :  { %1744 = vmatprep.mubr.msk.bf16.mxu0 %vm306_vm0, %v1972_v57  ;;  %951 = vmatpush1.bf16.msra.mxu0 %v2038_v3 }
  0x6b   :  { %952 = vmatprep.subr.bf16.mxu0 %v2043_v5 }
  0x6e   :  { %953 = vmatpush1.bf16.msra.mxu0 %v2041_v6 }
  0x71   :  { %452 = vmatmul.mubr.bf16.gmra.mrb[32].mxu0 %v1974_v58 }
  0x72   :  { %1745 = vmatprep.mubr.msk.bf16.mxu0 %vm306_vm0, %v1975_v59 }
  0x79   :  { %460 = vmatmul.mubr.bf16.gmra.mrb[36].mxu0 %v1977_v60 }
  0x7a   :  { %1746 = vmatprep.mubr.msk.bf16.mxu0 %vm306_vm0, %v1978_v61 }
  0x81   :  { %468 = vmatmul.mubr.bf16.gmra.mrb[40].mxu0 %v1980_v62 }
  0x82   :  { %1747 = vmatprep.mubr.msk.bf16.mxu0 %vm306_vm0, %v1981_v63 }
  0x89   :  { %476 = vmatmul.mubr.bf16.gmra.mrb[44].mxu0 %v1983_v2 }
  0x8a   :  { %1748 = vmatprep.mubr.msk.bf16.mxu0 %vm306_vm0, %v1984_v4 }
  0x91   :  { %484 = vmatmul.mubr.bf16.gmra.mrb[48].mxu0 %v1986_v7 }
  0x92   :  { %1749 = vmatprep.mubr.msk.bf16.mxu0 %vm306_vm0, %v1987_v8 }
  0x99   :  { %492 = vmatmul.mubr.bf16.gmra.mrb[52].mxu0 %v1989_v9 }
  0x9a   :  { %1750 = vmatprep.mubr.msk.bf16.mxu0 %vm306_vm0, %v1990_v10 }
  0xa1   :  { %500 = vmatmul.mubr.bf16.gmra.mrb[56].mxu0 %v1992_v11 }
  0xa2   :  { %1751 = vmatprep.mubr.msk.bf16.mxu0 %vm306_vm0, %v1993_v12 }
  0xa9   :  { %508 = vmatmul.mubr.bf16.gmra.mrb[60].mxu0 %v1995_v13 }
 0x104   :  { %v389_v16 = vpop.f32.mrb[0].mxu0 }
 0x105   :  { %v390_v17 = vadd.f32 %v2387_v15, %v389_v16  ;;  %v391_v18 = vpop.f32.mrb[1].mxu0 }
 0x106   :  { %v392_v19 = vpop.f32.mrb[2].mxu0 }
 0x107   :  { %v393_v20 = vadd.f32 %v2387_v15, %v392_v19  ;;  %v394_v21 = vpop.f32.mrb[3].mxu0  ;;  %v516_v22 = vmax.f32 %v390_v17, 0.0 }
 0x109   :  { %v517_v23 = vmax.f32 %v393_v20, 0.0 }
 0x10b   :  { %v551_v24 = vpack.c.bf16 %v517_v23, %v516_v22 }
 0x10c   :  { %v397_v25 = vpop.f32.mrb[4].mxu0 }
 0x10d   :  { %v398_v26 = vadd.f32 %v2387_v15, %v397_v25  ;;  %v399_v27 = vpop.f32.mrb[5].mxu0  ;;  %954 = vmatprep.mubr.bf16.mxu0 %v551_v24 }
 0x10e   :  { %v400_v28 = vpop.f32.mrb[6].mxu0  ;;  %955 = vmatmul.mubr.bf16.vlgmr.msra.gmra.mrb[64].mxu0 %v2084_v0 }
 0x10f   :  { %v401_v29 = vadd.f32 %v2387_v15, %v400_v28  ;;  %v402_v30 = vpop.f32.mrb[7].mxu0  ;;  %v518_v31 = vmax.f32 %v398_v26, 0.0 }
 0x111   :  { %v519_v32 = vmax.f32 %v401_v29, 0.0 }
 0x113   :  { %v2394_v33 = vpack.c.bf16 %v519_v32, %v518_v31 }
 0x114   :  { %v405_v34 = vpop.f32.mrb[8].mxu0 }
 0x115   :  { %v406_v35 = vadd.f32 %v2387_v15, %v405_v34  ;;  %v407_v36 = vpop.f32.mrb[9].mxu0  ;;  %964 = vmatprep.mubr.bf16.mxu0 %v2394_v33 }
 0x116   :  { %v408_v37 = vpop.f32.mrb[10].mxu0  ;;  %965 = vmatmul.mubr.bf16.gmra.mrb[68].mxu0 %v551_v24  ;;  %v2044_v36 = vld [vmem:[%s2770_s3 + $0x100] ss:$8 sps:$4 sm:$0xff]  }
 0x117   :  { %v409_v38 = vadd.f32 %v2387_v15, %v408_v37  ;;  %v410_v39 = vpop.f32.mrb[11].mxu0  ;;  %v520_v40 = vmax.f32 %v406_v35, 0.0 }
 0x119   :  { %v521_v41 = vmax.f32 %v409_v38, 0.0  ;;  %v2049_v38 = vld [vmem:[%s2770_s3 + $0x114] ss:$8 sps:$4 sm:$0xff]  }
 0x11b   :  { %v2399_v42 = vpack.c.bf16 %v521_v41, %v520_v40 }
 0x11c   :  { %v413_v43 = vpop.f32.mrb[12].mxu0 }
 0x11d   :  { %v414_v44 = vadd.f32 %v2387_v15, %v413_v43  ;;  %v415_v45 = vpop.f32.mrb[13].mxu0  ;;  %974 = vmatprep.mubr.bf16.mxu0 %v2399_v42 }
 0x11e   :  { %v416_v46 = vpop.f32.mrb[14].mxu0  ;;  %975 = vmatmul.mubr.bf16.gmra.mrb[72].mxu0 %v2394_v33  ;;  %v2047_v45 = vld [vmem:[%s2770_s3 + $0x110] ss:$8 sps:$4 sm:$0xff]  }
 0x11f   :  { %v417_v47 = vadd.f32 %v2387_v15, %v416_v46  ;;  %v418_v48 = vpop.f32.mrb[15].mxu0  ;;  %v522_v49 = vmax.f32 %v414_v44, 0.0  ;;  %v2052_v46 = vld [vmem:[%s2770_s3 + $0x124] ss:$8 sps:$4 sm:$0xff]  }
 0x121   :  { %v523_v50 = vmax.f32 %v417_v47, 0.0 }
 0x123   :  { %v2405_v51 = vpack.c.bf16 %v523_v50, %v522_v49  ;;  %v2050_v50 = vld [vmem:[%s2770_s3 + $0x120] ss:$8 sps:$4 sm:$0xff]  }
 0x124   :  { %v421_v52 = vpop.f32.mrb[16].mxu0 }
 0x125   :  { %v422_v53 = vadd.f32 %v2387_v15, %v421_v52  ;;  %v423_v54 = vpop.f32.mrb[17].mxu0  ;;  %984 = vmatprep.mubr.bf16.mxu0 %v2405_v51 }
 0x126   :  { %v424_v55 = vpop.f32.mrb[18].mxu0  ;;  %985 = vmatmul.mubr.bf16.gmra.mrb[76].mxu0 %v2399_v42 }
 0x127   :  { %v425_v56 = vadd.f32 %v2387_v15, %v424_v55  ;;  %v426_v57 = vpop.f32.mrb[19].mxu0  ;;  %v524_v58 = vmax.f32 %v422_v53, 0.0  ;;  %v2055_v53 = vld [vmem:[%s2770_s3 + $0x134] ss:$8 sps:$4 sm:$0xff]  }
 0x129   :  { %v525_v59 = vmax.f32 %v425_v56, 0.0 }
 0x12b   :  { %v2411_v60 = vpack.c.bf16 %v525_v59, %v524_v58  ;;  %v2053_v59 = vld [vmem:[%s2770_s3 + $0x130] ss:$8 sps:$4 sm:$0xff]  }
 0x12c   :  { %v429_v61 = vpop.f32.mrb[20].mxu0 }
 0x12d   :  { %v430_v62 = vadd.f32 %v2387_v15, %v429_v61  ;;  %v431_v63 = vpop.f32.mrb[21].mxu0  ;;  %994 = vmatprep.mubr.bf16.mxu0 %v2411_v60  ;;  %v2058_v61 = vld [vmem:[%s2770_s3 + $0x144] ss:$8 sps:$4 sm:$0xff]  }
 0x12e   :  { %v432_v1 = vpop.f32.mrb[22].mxu0  ;;  %995 = vmatmul.mubr.bf16.gmra.mrb[80].mxu0 %v2405_v51 }
 0x12f   :  { %v433_v2 = vadd.f32 %v2387_v15, %v432_v1  ;;  %v434_v3 = vpop.f32.mrb[23].mxu0  ;;  %v526_v4 = vmax.f32 %v430_v62, 0.0 }
 0x131   :  { %v527_v5 = vmax.f32 %v433_v2, 0.0  ;;  %v2056_v2 = vld [vmem:[%s2770_s3 + $0x140] ss:$8 sps:$4 sm:$0xff]  }
 0x133   :  { %v2417_v6 = vpack.c.bf16 %v527_v5, %v526_v4  ;;  %v2061_v4 = vld [vmem:[%s2770_s3 + $0x154] ss:$8 sps:$4 sm:$0xff]  }
 0x134   :  { %v437_v7 = vpop.f32.mrb[24].mxu0 }
 0x135   :  { %v438_v8 = vadd.f32 %v2387_v15, %v437_v7  ;;  %v439_v9 = vpop.f32.mrb[25].mxu0  ;;  %1004 = vmatprep.mubr.bf16.mxu0 %v2417_v6 }
 0x136   :  { %v440_v10 = vpop.f32.mrb[26].mxu0  ;;  %1005 = vmatmul.mubr.bf16.gmra.mrb[84].mxu0 %v2411_v60 }
 0x137   :  { %v441_v11 = vadd.f32 %v2387_v15, %v440_v10  ;;  %v442_v12 = vpop.f32.mrb[27].mxu0  ;;  %v528_v13 = vmax.f32 %v438_v8, 0.0 }
 0x138   :  { %v2064_v12 = vld [vmem:[%s2770_s3 + $0x164] ss:$8 sps:$4 sm:$0xff]  }
 0x139   :  { %v529_v14 = vmax.f32 %v441_v11, 0.0  ;;  %v2059_v11 = vld [vmem:[%s2770_s3 + $0x150] ss:$8 sps:$4 sm:$0xff]  }
 0x13b   :  { %v2423_v16 = vpack.c.bf16 %v529_v14, %v528_v13 }
 0x13c   :  { %v445_v17 = vpop.f32.mrb[28].mxu0 }
 0x13d   :  { %v446_v18 = vadd.f32 %v2387_v15, %v445_v17  ;;  %v447_v19 = vpop.f32.mrb[29].mxu0  ;;  %1014 = vmatprep.mubr.bf16.mxu0 %v2423_v16 }
 0x13e   :  { %v448_v20 = vpop.f32.mrb[30].mxu0  ;;  %1015 = vmatmul.mubr.bf16.gmra.mrb[88].mxu0 %v2417_v6 }
 0x13f   :  { %v449_v21 = vadd.f32 %v2387_v15, %v448_v20  ;;  %v450_v22 = vpop.f32.mrb[31].mxu0  ;;  %v530_v23 = vmax.f32 %v446_v18, 0.0  ;;  %v2062_v18 = vld [vmem:[%s2770_s3 + $0x160] ss:$8 sps:$4 sm:$0xff]   ;;  %v2067_v20 = vld [vmem:[%s2770_s3 + $0x174] ss:$8 sps:$4 sm:$0xff]  }
 0x141   :  { %v531_v24 = vmax.f32 %v449_v21, 0.0 }
 0x143   :  { %v2429_v25 = vpack.c.bf16 %v531_v24, %v530_v23 }
 0x144   :  { %v453_v26 = vpop.f32.mrb[32].mxu0 }
 0x145   :  { %v454_v27 = vadd.f32 %v2387_v15, %v453_v26  ;;  %v455_v28 = vpop.f32.mrb[33].mxu0  ;;  %1024 = vmatprep.mubr.bf16.mxu0 %v2429_v25 }
 0x146   :  { %v456_v29 = vpop.f32.mrb[34].mxu0  ;;  %1025 = vmatmul.mubr.bf16.gmra.mrb[92].mxu0 %v2423_v16 }
 0x147   :  { %v457_v30 = vadd.f32 %v2387_v15, %v456_v29  ;;  %v458_v31 = vpop.f32.mrb[35].mxu0  ;;  %v532_v32 = vmax.f32 %v454_v27, 0.0  ;;  %v2065_v27 = vld [vmem:[%s2770_s3 + $0x170] ss:$8 sps:$4 sm:$0xff]  }
 0x149   :  { %v533_v34 = vmax.f32 %v457_v30, 0.0 }
 0x14b   :  { %v2435_v35 = vpack.c.bf16 %v533_v34, %v532_v32 }
 0x14c   :  { %v461_v37 = vpop.f32.mrb[36].mxu0 }
 0x14d   :  { %v462_v39 = vadd.f32 %v2387_v15, %v461_v37  ;;  %v463_v40 = vpop.f32.mrb[37].mxu0  ;;  %1034 = vmatprep.mubr.bf16.mxu1 %v2435_v35 }
 0x14e   :  { %v464_v41 = vpop.f32.mrb[38].mxu0  ;;  %1035 = vmatmul.mubr.bf16.vlgmr.msra.gmra.mrb[0].mxu1 %v2429_v25 }
 0x14f   :  { %v465_v43 = vadd.f32 %v2387_v15, %v464_v41  ;;  %1116 = vmatpush1.bf16.msra.mxu1 %v2044_v36  ;;  %v466_v44 = vpop.f32.mrb[39].mxu0  ;;  %v534_v47 = vmax.f32 %v462_v39, 0.0 }
 0x150   :  { %1117 = vmatprep.subr.bf16.mxu1 %v2049_v38 }
 0x151   :  { %v535_v48 = vmax.f32 %v465_v43, 0.0 }
 0x153   :  { %v2453_v49 = vpack.c.bf16 %v535_v48, %v534_v47  ;;  %1118 = vmatpush1.bf16.msra.mxu1 %v2047_v45 }
 0x154   :  { %v469_v52 = vpop.f32.mrb[40].mxu0  ;;  %1119 = vmatprep.subr.bf16.mxu1 %v2052_v46 }
 0x155   :  { %v470_v54 = vadd.f32 %v2387_v15, %v469_v52  ;;  %v471_v55 = vpop.f32.mrb[41].mxu0  ;;  %1044 = vmatprep.mubr.bf16.mxu1 %v2453_v49 }
 0x156   :  { %v472_v56 = vpop.f32.mrb[42].mxu0  ;;  %1045 = vmatmul.mubr.bf16.gmra.mrb[4].mxu1 %v2435_v35 }
 0x157   :  { %v473_v57 = vadd.f32 %v2387_v15, %v472_v56  ;;  %v474_v58 = vpop.f32.mrb[43].mxu0  ;;  %1120 = vmatpush1.bf16.msra.mxu1 %v2050_v50  ;;  %v536_v62 = vmax.f32 %v470_v54, 0.0 }
 0x158   :  { %1121 = vmatprep.subr.bf16.mxu1 %v2055_v53 }
 0x159   :  { %v537_v63 = vmax.f32 %v473_v57, 0.0 }
 0x15b   :  { %v2471_v1 = vpack.c.bf16 %v537_v63, %v536_v62  ;;  %1122 = vmatpush1.bf16.msra.mxu1 %v2053_v59 }
 0x15c   :  { %v477_v3 = vpop.f32.mrb[44].mxu0  ;;  %1123 = vmatprep.subr.bf16.mxu1 %v2058_v61 }
 0x15d   :  { %v478_v5 = vadd.f32 %v2387_v15, %v477_v3  ;;  %v479_v7 = vpop.f32.mrb[45].mxu0  ;;  %1054 = vmatprep.mubr.bf16.mxu1 %v2471_v1 }
 0x15e   :  { %v480_v8 = vpop.f32.mrb[46].mxu0  ;;  %1055 = vmatmul.mubr.bf16.gmra.mrb[8].mxu1 %v2453_v49 }
 0x15f   :  { %v481_v9 = vadd.f32 %v2387_v15, %v480_v8  ;;  %v482_v10 = vpop.f32.mrb[47].mxu0  ;;  %1124 = vmatpush1.bf16.msra.mxu1 %v2056_v2  ;;  %v538_v13 = vmax.f32 %v478_v5, 0.0 }
 0x160   :  { %1125 = vmatprep.subr.bf16.mxu1 %v2061_v4 }
 0x161   :  { %v539_v14 = vmax.f32 %v481_v9, 0.0 }
 0x163   :  { %v2489_v17 = vpack.c.bf16 %v539_v14, %v538_v13  ;;  %1126 = vmatpush1.bf16.msra.mxu1 %v2059_v11 }
 0x164   :  { %v485_v19 = vpop.f32.mrb[48].mxu0  ;;  %1127 = vmatprep.subr.bf16.mxu1 %v2064_v12 }
 0x165   :  { %v486_v21 = vadd.f32 %v2387_v15, %v485_v19  ;;  %v487_v22 = vpop.f32.mrb[49].mxu0  ;;  %1064 = vmatprep.mubr.bf16.mxu1 %v2489_v17 }
 0x166   :  { %v488_v23 = vpop.f32.mrb[50].mxu0  ;;  %1065 = vmatmul.mubr.bf16.gmra.mrb[12].mxu1 %v2471_v1 }
 0x167   :  { %v489_v24 = vadd.f32 %v2387_v15, %v488_v23  ;;  %v490_v26 = vpop.f32.mrb[51].mxu0  ;;  %1128 = vmatpush1.bf16.msra.mxu1 %v2062_v18  ;;  %v540_v28 = vmax.f32 %v486_v21, 0.0 }
 0x168   :  { %1129 = vmatprep.subr.bf16.mxu1 %v2067_v20  ;;  %v2068_v26 = vld [vmem:[%s2772_s5 + $0x40] sm:$0xff]  }
 0x169   :  { %v541_v29 = vmax.f32 %v489_v24, 0.0  ;;  %1817 = vmatprep.subr.bf16.mxu0 %v2068_v26 }
 0x16b   :  { %v2504_v30 = vpack.c.bf16 %v541_v29, %v540_v28  ;;  %1130 = vmatpush1.bf16.msra.mxu1 %v2065_v27  ;;  %v2069_v27 = vld [vmem:[%s2772_s5] sm:$0xff]   ;;  %v2070_v28 = vld [vmem:[%s2772_s5 + $0x48] sm:$0xff]  }
 0x16c   :  { %v493_v31 = vpop.f32.mrb[52].mxu0  ;;  %1818 = vmatpush3.bf16.msra.mxu0 %v2069_v27  ;;  %v2071_v29 = vld [vmem:[%s2772_s5 + $0x8] sm:$0xff]  }
 0x16d   :  { %v494_v32 = vadd.f32 %v2387_v15, %v493_v31  ;;  %v495_v34 = vpop.f32.mrb[53].mxu0  ;;  %1074 = vmatprep.mubr.bf16.mxu1 %v2504_v30  ;;  %1819 = vmatprep.subr.bf16.mxu0 %v2070_v28  ;;  %v2073_v31 = vld [vmem:[%s2772_s5 + $0x10] sm:$0xff]  }
 0x16e   :  { %v496_v36 = vpop.f32.mrb[54].mxu0  ;;  %1075 = vmatmul.mubr.bf16.gmra.mrb[16].mxu1 %v2489_v17  ;;  %v2075_v34 = vld [vmem:[%s2772_s5 + $0x18] sm:$0xff]  }
 0x16f   :  { %v497_v37 = vadd.f32 %v2387_v15, %v496_v36  ;;  %v498_v38 = vpop.f32.mrb[55].mxu0  ;;  %v542_v39 = vmax.f32 %v494_v32, 0.0  ;;  %v2074_v32 = vld [vmem:[%s2772_s5 + $0x58] sm:$0xff]   ;;  %v2076_v36 = vld [vmem:[%s2772_s5 + $0x60] sm:$0xff]  }
 0x170   :  { %1820 = vmatpush3.bf16.msra.mxu0 %v2071_v29  ;;  %v2078_v38 = vld [vmem:[%s2772_s5 + $0x68] sm:$0xff]  }
 0x171   :  { %v543_v40 = vmax.f32 %v497_v37, 0.0  ;;  %v2077_v37 = vld [vmem:[%s2772_s5 + $0x20] sm:$0xff]  }
 0x173   :  { %v564_v41 = vpack.c.bf16 %v543_v40, %v542_v39  ;;  %v2079_v39 = vld [vmem:[%s2772_s5 + $0x28] sm:$0xff]   ;;  %v2080_v40 = vld [vmem:[%s2772_s5 + $0x70] sm:$0xff]  }
 0x174   :  { %v501_v43 = vpop.f32.mrb[56].mxu0 }
 0x175   :  { %v502_v44 = vadd.f32 %v2387_v15, %v501_v43  ;;  %v503_v45 = vpop.f32.mrb[57].mxu0  ;;  %1084 = vmatprep.mubr.bf16.mxu1 %v564_v41  ;;  %v1309_v43 = vlaneseq }
 0x176   :  { %v504_v46 = vpop.f32.mrb[58].mxu0  ;;  %1085 = vmatmul.mubr.bf16.gmra.mrb[20].mxu1 %v2504_v30  ;;  %v2082_v45 = vld [vmem:[%s2772_s5 + $0x78] sm:$0xff]  }
 0x177   :  { %v505_v47 = vadd.f32 %v2387_v15, %v504_v46  ;;  %v506_v48 = vpop.f32.mrb[59].mxu0  ;;  %v544_v50 = vmax.f32 %v502_v44, 0.0  ;;  %v1310_v44 = vshrl.u32 %v1309_v43, 7 }
 0x179   :  { %v545_v52 = vmax.f32 %v505_v47, 0.0  ;;  %v2083_v47 = vld [vmem:[%s2772_s5 + $0x38] sm:$0xff]  }
 0x17b   :  { %v565_v53 = vpack.c.bf16 %v545_v52, %v544_v50  ;;  %v1311_v50 = vsub.s32 0, %v1310_v44 }
 0x17c   :  { %v509_v54 = vpop.f32.mrb[60].mxu0 }
 0x17d   :  { %v510_v55 = vadd.f32 %v2387_v15, %v509_v54  ;;  %v511_v56 = vpop.f32.mrb[61].mxu0  ;;  %1094 = vmatprep.mubr.bf16.mxu1 %v565_v53 }
 0x17e   :  { %v512_v57 = vpop.f32.mrb[62].mxu0  ;;  %1095 = vmatmul.mubr.bf16.gmra.mrb[24].mxu1 %v564_v41 }
 0x17f   :  { %v513_v58 = vadd.f32 %v2387_v15, %v512_v57  ;;  %v514_v59 = vpop.f32.mrb[63].mxu0  ;;  %v546_v61 = vmax.f32 %v510_v55, 0.0  ;;  %v1315_v55 = vsub.s32 1, %v1310_v44 }
 0x181   :  { %v547_v62 = vmax.f32 %v513_v58, 0.0 }
 0x183   :  { %v566_v63 = vpack.c.bf16 %v547_v62, %v546_v61 }
 0x185   :  { %1104 = vmatprep.mubr.bf16.mxu1 %v566_v63 }
 0x186   :  { %1105 = vmatmul.mubr.bf16.gmra.mrb[28].mxu1 %v565_v53 }
 0x187   :  { %1147 = vmatprep.mubr.bf16.mxu1 %v2084_v0 }
 0x18e   :  { %1148 = vmatmul.mubr.bf16.vlgmr.msra.gmra.mrb[32].mxu1 %v2394_v33 }
 0x18f   :  { %1157 = vmatprep.mubr.bf16.mxu1 %v2084_v0 }
 0x196   :  { %1158 = vmatmul.mubr.bf16.gmra.mrb[36].mxu1 %v2399_v42 }
 0x197   :  { %1167 = vmatprep.mubr.bf16.mxu1 %v2084_v0 }
 0x19e   :  { %1168 = vmatmul.mubr.bf16.gmra.mrb[40].mxu1 %v2405_v51 }
 0x19f   :  { %1177 = vmatprep.mubr.bf16.mxu1 %v2084_v0 }
 0x1a6   :  { %1178 = vmatmul.mubr.bf16.gmra.mrb[44].mxu1 %v2411_v60 }
 0x1a7   :  { %1187 = vmatprep.mubr.bf16.mxu1 %v2084_v0 }
 0x1ae   :  { %1188 = vmatmul.mubr.bf16.gmra.mrb[48].mxu1 %v2417_v6 }
 0x1af   :  { %1197 = vmatprep.mubr.bf16.mxu1 %v2084_v0 }
 0x1b6   :  { %1198 = vmatmul.mubr.bf16.gmra.mrb[52].mxu1 %v2423_v16 }
 0x1b7   :  { %1207 = vmatprep.mubr.bf16.mxu1 %v2084_v0 }
 0x1be   :  { %1208 = vmatmul.mubr.bf16.gmra.mrb[56].mxu1 %v2429_v25 }
 0x1bf   :  { %1217 = vmatprep.mubr.bf16.mxu1 %v2084_v0 }
 0x1c6   :  { %1218 = vmatmul.mubr.bf16.gmra.mrb[60].mxu1 %v2435_v35 }
 0x1c7   :  { %1227 = vmatprep.mubr.bf16.mxu1 %v2084_v0 }
 0x1ce   :  { %1228 = vmatmul.mubr.bf16.gmra.mrb[0].mxu1 %v2453_v49 }
 0x1cf   :  { %1237 = vmatprep.mubr.bf16.mxu1 %v2084_v0 }
 0x1d6   :  { %1238 = vmatmul.mubr.bf16.gmra.mrb[4].mxu1 %v2471_v1 }
 0x1d7   :  { %1247 = vmatprep.mubr.bf16.mxu1 %v2084_v0 }
 0x1de   :  { %1248 = vmatmul.mubr.bf16.gmra.mrb[8].mxu1 %v2489_v17 }
 0x1df   :  { %1257 = vmatprep.mubr.bf16.mxu1 %v2084_v0 }
 0x1e1   :  { %v2538_v15 = vpop.f32.mrb[64].mxu0 }
 0x1e2   :  { %v2540_v33 = vpop.f32.mrb[65].mxu0 }
 0x1e3   :  { %v2542_v42 = vpop.f32.mrb[66].mxu0 }
 0x1e4   :  { %v2544_v51 = vpop.f32.mrb[67].mxu0 }
 0x1e6   :  { %1258 = vmatmul.mubr.bf16.gmra.mrb[12].mxu1 %v2504_v30  ;;  %v2072_v30 = vld [vmem:[%s2772_s5 + $0x50] sm:$0xff]  }
 0x1e7   :  { %1267 = vmatprep.mubr.bf16.mxu1 %v2084_v0  ;;  %1821 = vmatprep.subr.bf16.mxu0 %v2072_v30 }
 0x1e8   :  { %1822 = vmatpush3.bf16.msra.mxu0 %v2073_v31 }
 0x1e9   :  { %v2548_v60 = vpop.f32.mrb[68].mxu0  ;;  %1823 = vmatprep.subr.bf16.mxu0 %v2074_v32 }
 0x1ea   :  { %v2550_v6 = vpop.f32.mrb[69].mxu0 }
 0x1eb   :  { %v2552_v16 = vpop.f32.mrb[70].mxu0 }
 0x1ec   :  { %v2554_v25 = vpop.f32.mrb[71].mxu0  ;;  %1824 = vmatpush3.bf16.msra.mxu0 %v2075_v34 }
 0x1ed   :  { %1825 = vmatprep.subr.bf16.mxu0 %v2076_v36 }
 0x1ee   :  { %1268 = vmatmul.mubr.bf16.gmra.mrb[16].mxu1 %v564_v41  ;;  %v2081_v41 = vld [vmem:[%s2772_s5 + $0x30] sm:$0xff]  }
 0x1ef   :  { %1277 = vmatprep.mubr.bf16.mxu1 %v2084_v0 }
 0x1f0   :  { %1826 = vmatpush3.bf16.msra.mxu0 %v2077_v37 }
 0x1f1   :  { %v2557_v35 = vpop.f32.mrb[72].mxu0  ;;  %1827 = vmatprep.subr.bf16.mxu0 %v2078_v38 }
 0x1f2   :  { %v2559_v49 = vpop.f32.mrb[73].mxu0 }
 0x1f3   :  { %v2561_v1 = vpop.f32.mrb[74].mxu0 }
 0x1f4   :  { %v2563_v2 = vpop.f32.mrb[75].mxu0  ;;  %1828 = vmatpush3.bf16.msra.mxu0 %v2079_v39 }
 0x1f5   :  { %1829 = vmatprep.subr.bf16.mxu0 %v2080_v40 }
 0x1f6   :  { %1278 = vmatmul.mubr.bf16.gmra.mrb[20].mxu1 %v565_v53  ;;  %v633_v53 = vld [vmem:[%s2773_s4] sm:$0x3] }
 0x1f7   :  { %1287 = vmatprep.mubr.bf16.mxu1 %v2084_v0  ;;  %v2663_v61 = vrot.slane %v633_v53, %v1311_v50  ;;  %v2665_v62 = vrot.slane %v633_v53, %v1315_v55 }
 0x1f8   :  { %1830 = vmatpush3.bf16.msra.mxu0 %v2081_v41 }
 0x1f9   :  { %v2566_v3 = vpop.f32.mrb[76].mxu0  ;;  %1831 = vmatprep.subr.bf16.mxu0 %v2082_v45 }
 0x1fa   :  { %v2568_v4 = vpop.f32.mrb[77].mxu0 }
 0x1fb   :  { %v2570_v5 = vpop.f32.mrb[78].mxu0 }
 0x1fc   :  { %v2572_v7 = vpop.f32.mrb[79].mxu0  ;;  %1832 = vmatpush3.bf16.msra.mxu0 %v2083_v47 }
 0x1fe   :  { %1288 = vmatmul.mubr.bf16.gmra.mrb[24].mxu1 %v566_v63 }
 0x1ff   :  { %1297 = vmatprep.mubr.bf16.mxu1 %v2084_v0 }
 0x201   :  { %v2575_v8 = vpop.f32.mrb[80].mxu0 }
 0x202   :  { %v2577_v9 = vpop.f32.mrb[81].mxu0 }
 0x203   :  { %v2579_v10 = vpop.f32.mrb[82].mxu0 }
 0x204   :  { %v2581_v11 = vpop.f32.mrb[83].mxu0 }
 0x206   :  { %1298 = vmatmul.mubr.bf16.gmra.mrb[28].mxu1 %v2084_v0 }
 0x209   :  { %v2584_v12 = vpop.f32.mrb[84].mxu0 }
 0x20a   :  { %v2586_v13 = vpop.f32.mrb[85].mxu0 }
 0x20b   :  { %v2588_v14 = vpop.f32.mrb[86].mxu0 }
 0x20c   :  { %v2590_v17 = vpop.f32.mrb[87].mxu0 }
 0x211   :  { %v2592_v18 = vpop.f32.mrb[88].mxu0 }
 0x212   :  { %v2594_v19 = vpop.f32.mrb[89].mxu0 }
 0x213   :  { %v2596_v20 = vpop.f32.mrb[90].mxu0 }
 0x214   :  { %v2598_v21 = vpop.f32.mrb[91].mxu0 }
 0x219   :  { %v2600_v22 = vpop.f32.mrb[92].mxu0 }
 0x21a   :  { %v2602_v23 = vpop.f32.mrb[93].mxu0 }
 0x21b   :  { %v2604_v0 = vpop.f32.mrb[94].mxu0 }
 0x21c   :  { %v2606_v24 = vpop.f32.mrb[95].mxu0 }
 0x261   :  { %v1149_v46 = vpop.f32.mrb[32].mxu1 }
 0x262   :  { %v1150_v48 = vadd.f32 %v1149_v46, %v2538_v15  ;;  %v1151_v52 = vpop.f32.mrb[33].mxu1 }
 0x263   :  { %v1152_v54 = vadd.f32 %v1151_v52, %v2540_v33  ;;  %v1153_v56 = vpop.f32.mrb[34].mxu1 }
 0x264   :  { %v1154_v57 = vadd.f32 %v1153_v56, %v2542_v42  ;;  %v1155_v58 = vpop.f32.mrb[35].mxu1  ;;  %v1319_v15 = vadd.f32 %v2663_v61, %v1150_v48 }
 0x265   :  { %v1156_v59 = vadd.f32 %v1155_v58, %v2544_v51  ;;  %v1320_v33 = vadd.f32 %v2665_v62, %v1152_v54 }
 0x266   :  { %v1321_v42 = vadd.f32 %v2663_v61, %v1154_v57 }
 0x267   :  { %v1322_v32 = vadd.f32 %v2665_v62, %v1156_v59  ;;  %v1384_v39 = vmax.f32 %v1320_v33, 0.0 }
 0x268   :  { %v1385_v41 = vmax.f32 %v1321_v42, 0.0 }
 0x269   :  { %v1159_v63 = vpop.f32.mrb[36].mxu1  ;;  %v1386_v45 = vmax.f32 %v1322_v32, 0.0 }
 0x26a   :  { %v1160_v26 = vadd.f32 %v1159_v63, %v2548_v60  ;;  %v1161_v27 = vpop.f32.mrb[37].mxu1  ;;  %v1383_v60 = vmax.f32 %v1319_v15, 0.0 }
 0x26b   :  { %v1162_v28 = vadd.f32 %v1161_v27, %v2550_v6  ;;  %v1163_v29 = vpop.f32.mrb[38].mxu1 }
 0x26c   :  { %v1323_v30 = vadd.f32 %v2663_v61, %v1160_v26  ;;  %v1164_v51 = vadd.f32 %v1163_v29, %v2552_v16  ;;  %v1165_v31 = vpop.f32.mrb[39].mxu1 }
 0x26d   :  { %v1324_v34 = vadd.f32 %v2665_v62, %v1162_v28  ;;  %v1166_v36 = vadd.f32 %v1165_v31, %v2554_v25 }
 0x26e   :  { %v1387_v37 = vmax.f32 %v1323_v30, 0.0  ;;  %v1325_v38 = vadd.f32 %v2663_v61, %v1164_v51 }
 0x26f   :  { %v1388_v6 = vmax.f32 %v1324_v34, 0.0  ;;  %v1326_v40 = vadd.f32 %v2665_v62, %v1166_v36 }
 0x270   :  { %v1447_v43 = vadd.f32 %v1387_v37, %v1383_v60  ;;  %v1389_v44 = vmax.f32 %v1325_v38, 0.0 }
 0x271   :  { %v1462_v16 = vadd.f32 %v1388_v6, %v1384_v39  ;;  %v1390_v46 = vmax.f32 %v1326_v40, 0.0  ;;  %v1169_v47 = vpop.f32.mrb[40].mxu1 }
 0x272   :  { %v1477_v48 = vadd.f32 %v1389_v44, %v1385_v41  ;;  %v1170_v50 = vadd.f32 %v1169_v47, %v2557_v35  ;;  %v1171_v52 = vpop.f32.mrb[41].mxu1 }
 0x273   :  { %v1492_v25 = vadd.f32 %v1390_v46, %v1386_v45  ;;  %v1172_v53 = vadd.f32 %v1171_v52, %v2559_v49  ;;  %v1173_v54 = vpop.f32.mrb[42].mxu1 }
 0x274   :  { %v1327_v55 = vadd.f32 %v2663_v61, %v1170_v50  ;;  %v1174_v56 = vadd.f32 %v1173_v54, %v2561_v1  ;;  %v1175_v57 = vpop.f32.mrb[43].mxu1 }
 0x275   :  { %v1328_v58 = vadd.f32 %v2665_v62, %v1172_v53  ;;  %v1176_v59 = vadd.f32 %v1175_v57, %v2563_v2 }
 0x276   :  { %v1391_v63 = vmax.f32 %v1327_v55, 0.0  ;;  %v1329_v15 = vadd.f32 %v2663_v61, %v1174_v56 }
 0x277   :  { %v1392_v26 = vmax.f32 %v1328_v58, 0.0  ;;  %v1330_v35 = vadd.f32 %v2665_v62, %v1176_v59 }
 0x278   :  { %v1448_v27 = vadd.f32 %v1447_v43, %v1391_v63  ;;  %v1393_v33 = vmax.f32 %v1329_v15, 0.0 }
 0x279   :  { %v1463_v28 = vadd.f32 %v1462_v16, %v1392_v26  ;;  %v1394_v49 = vmax.f32 %v1330_v35, 0.0  ;;  %v1179_v29 = vpop.f32.mrb[44].mxu1 }
 0x27a   :  { %v1478_v42 = vadd.f32 %v1477_v48, %v1393_v33  ;;  %v1180_v30 = vadd.f32 %v1179_v29, %v2566_v3  ;;  %v1181_v1 = vpop.f32.mrb[45].mxu1 }
 0x27b   :  { %v1493_v51 = vadd.f32 %v1492_v25, %v1394_v49  ;;  %v1182_v31 = vadd.f32 %v1181_v1, %v2568_v4  ;;  %v1183_v32 = vpop.f32.mrb[46].mxu1 }
 0x27c   :  { %v1331_v2 = vadd.f32 %v2663_v61, %v1180_v30  ;;  %v1184_v34 = vadd.f32 %v1183_v32, %v2570_v5  ;;  %v1185_v36 = vpop.f32.mrb[47].mxu1 }
 0x27d   :  { %v1332_v60 = vadd.f32 %v2665_v62, %v1182_v31  ;;  %v1186_v37 = vadd.f32 %v1185_v36, %v2572_v7 }
 0x27e   :  { %v1395_v38 = vmax.f32 %v1331_v2, 0.0  ;;  %v1333_v39 = vadd.f32 %v2663_v61, %v1184_v34 }
 0x27f   :  { %v1396_v6 = vmax.f32 %v1332_v60, 0.0  ;;  %v1334_v3 = vadd.f32 %v2665_v62, %v1186_v37 }
 0x280   :  { %v1449_v40 = vadd.f32 %v1448_v27, %v1395_v38  ;;  %v1397_v41 = vmax.f32 %v1333_v39, 0.0 }
 0x281   :  { %v1464_v43 = vadd.f32 %v1463_v28, %v1396_v6  ;;  %v1398_v4 = vmax.f32 %v1334_v3, 0.0  ;;  %v1189_v44 = vpop.f32.mrb[48].mxu1 }
 0x282   :  { %v1479_v45 = vadd.f32 %v1478_v42, %v1397_v41  ;;  %v1190_v16 = vadd.f32 %v1189_v44, %v2575_v8  ;;  %v1191_v5 = vpop.f32.mrb[49].mxu1 }
 0x283   :  { %v1494_v46 = vadd.f32 %v1493_v51, %v1398_v4  ;;  %v1192_v47 = vadd.f32 %v1191_v5, %v2577_v9  ;;  %v1193_v48 = vpop.f32.mrb[50].mxu1 }
 0x284   :  { %v1335_v7 = vadd.f32 %v2663_v61, %v1190_v16  ;;  %v1194_v50 = vadd.f32 %v1193_v48, %v2579_v10  ;;  %v1195_v52 = vpop.f32.mrb[51].mxu1 }
 0x285   :  { %v1336_v25 = vadd.f32 %v2665_v62, %v1192_v47  ;;  %v1196_v53 = vadd.f32 %v1195_v52, %v2581_v11 }
 0x286   :  { %v1399_v54 = vmax.f32 %v1335_v7, 0.0  ;;  %v1337_v55 = vadd.f32 %v2663_v61, %v1194_v50 }
 0x287   :  { %v1400_v56 = vmax.f32 %v1336_v25, 0.0  ;;  %v1338_v8 = vadd.f32 %v2665_v62, %v1196_v53 }
 0x288   :  { %v1450_v57 = vadd.f32 %v1449_v40, %v1399_v54  ;;  %v1401_v58 = vmax.f32 %v1337_v55, 0.0 }
 0x289   :  { %v1465_v59 = vadd.f32 %v1464_v43, %v1400_v56  ;;  %v1402_v9 = vmax.f32 %v1338_v8, 0.0  ;;  %v1199_v63 = vpop.f32.mrb[52].mxu1 }
 0x28a   :  { %v1480_v15 = vadd.f32 %v1479_v45, %v1401_v58  ;;  %v1200_v26 = vadd.f32 %v1199_v63, %v2584_v12  ;;  %v1201_v10 = vpop.f32.mrb[53].mxu1 }
 0x28b   :  { %v1495_v35 = vadd.f32 %v1494_v46, %v1402_v9  ;;  %v1202_v27 = vadd.f32 %v1201_v10, %v2586_v13  ;;  %v1203_v33 = vpop.f32.mrb[54].mxu1 }
 0x28c   :  { %v1339_v11 = vadd.f32 %v2663_v61, %v1200_v26  ;;  %v1204_v28 = vadd.f32 %v1203_v33, %v2588_v14  ;;  %v1205_v49 = vpop.f32.mrb[55].mxu1 }
 0x28d   :  { %v1340_v29 = vadd.f32 %v2665_v62, %v1202_v27  ;;  %v1206_v42 = vadd.f32 %v1205_v49, %v2590_v17 }
 0x28e   :  { %v1403_v30 = vmax.f32 %v1339_v11, 0.0  ;;  %v1341_v1 = vadd.f32 %v2663_v61, %v1204_v28 }
 0x28f   :  { %v1404_v51 = vmax.f32 %v1340_v29, 0.0  ;;  %v1342_v12 = vadd.f32 %v2665_v62, %v1206_v42 }
 0x290   :  { %v1451_v31 = vadd.f32 %v1450_v57, %v1403_v30  ;;  %v1405_v32 = vmax.f32 %v1341_v1, 0.0 }
 0x291   :  { %v1466_v2 = vadd.f32 %v1465_v59, %v1404_v51  ;;  %v1406_v13 = vmax.f32 %v1342_v12, 0.0  ;;  %v1209_v34 = vpop.f32.mrb[56].mxu1 }
 0x292   :  { %v1481_v36 = vadd.f32 %v1480_v15, %v1405_v32  ;;  %v1210_v60 = vadd.f32 %v1209_v34, %v2592_v18  ;;  %v1211_v14 = vpop.f32.mrb[57].mxu1 }
 0x293   :  { %v1496_v37 = vadd.f32 %v1495_v35, %v1406_v13  ;;  %v1212_v38 = vadd.f32 %v1211_v14, %v2594_v19  ;;  %v1213_v39 = vpop.f32.mrb[58].mxu1 }
 0x294   :  { %v1343_v17 = vadd.f32 %v2663_v61, %v1210_v60  ;;  %v1214_v6 = vadd.f32 %v1213_v39, %v2596_v20  ;;  %v1215_v3 = vpop.f32.mrb[59].mxu1 }
 0x295   :  { %v1344_v40 = vadd.f32 %v2665_v62, %v1212_v38  ;;  %v1216_v41 = vadd.f32 %v1215_v3, %v2598_v21 }
 0x296   :  { %v1407_v43 = vmax.f32 %v1343_v17, 0.0  ;;  %v1345_v4 = vadd.f32 %v2663_v61, %v1214_v6 }
 0x297   :  { %v1408_v44 = vmax.f32 %v1344_v40, 0.0  ;;  %v1346_v18 = vadd.f32 %v2665_v62, %v1216_v41 }
 0x298   :  { %v1452_v45 = vadd.f32 %v1451_v31, %v1407_v43  ;;  %v1409_v16 = vmax.f32 %v1345_v4, 0.0 }
 0x299   :  { %v1467_v5 = vadd.f32 %v1466_v2, %v1408_v44  ;;  %v1410_v19 = vmax.f32 %v1346_v18, 0.0  ;;  %v1219_v46 = vpop.f32.mrb[60].mxu1 }
 0x29a   :  { %v1482_v47 = vadd.f32 %v1481_v36, %v1409_v16  ;;  %v1220_v48 = vadd.f32 %v1219_v46, %v2600_v22  ;;  %v1221_v20 = vpop.f32.mrb[61].mxu1 }
 0x29b   :  { %v1497_v7 = vadd.f32 %v1496_v37, %v1410_v19  ;;  %v1222_v50 = vadd.f32 %v1221_v20, %v2602_v23  ;;  %v1223_v52 = vpop.f32.mrb[62].mxu1 }
 0x29c   :  { %v1347_v21 = vadd.f32 %v2663_v61, %v1220_v48  ;;  %v1224_v25 = vadd.f32 %v1223_v52, %v2604_v0  ;;  %v1225_v53 = vpop.f32.mrb[63].mxu1 }
 0x29d   :  { %v1348_v54 = vadd.f32 %v2665_v62, %v1222_v50  ;;  %v1226_v55 = vadd.f32 %v1225_v53, %v2606_v24 }
 0x29e   :  { %v1411_v56 = vmax.f32 %v1347_v21, 0.0  ;;  %v1349_v8 = vadd.f32 %v2663_v61, %v1224_v25 }
 0x29f   :  { %v1412_v57 = vmax.f32 %v1348_v54, 0.0  ;;  %v1350_v22 = vadd.f32 %v2665_v62, %v1226_v55 }
 0x2a0   :  { %v1413_v58 = vmax.f32 %v1349_v8, 0.0  ;;  %v1453_v59 = vadd.f32 %v1452_v45, %v1411_v56 }
 0x2a1   :  { %v1414_v9 = vmax.f32 %v1350_v22, 0.0  ;;  %v1229_v23 = vpop.f32.mrb[0].mxu1  ;;  %v1468_v63 = vadd.f32 %v1467_v5, %v1412_v57 }
 0x2a2   :  { %v1351_v15 = vadd.f32 %v2663_v61, %v1229_v23  ;;  %v1231_v26 = vpop.f32.mrb[1].mxu1  ;;  %v1483_v0 = vadd.f32 %v1482_v47, %v1413_v58 }
 0x2a3   :  { %v1352_v10 = vadd.f32 %v2665_v62, %v1231_v26  ;;  %v1233_v35 = vpop.f32.mrb[2].mxu1  ;;  %v1498_v27 = vadd.f32 %v1497_v7, %v1414_v9 }
 0x2a4   :  { %v1415_v24 = vmax.f32 %v1351_v15, 0.0  ;;  %v1353_v33 = vadd.f32 %v2663_v61, %v1233_v35  ;;  %v1235_v11 = vpop.f32.mrb[3].mxu1 }
 0x2a5   :  { %v1416_v28 = vmax.f32 %v1352_v10, 0.0  ;;  %v1354_v49 = vadd.f32 %v2665_v62, %v1235_v11 }
 0x2a6   :  { %v1454_v29 = vadd.f32 %v1453_v59, %v1415_v24  ;;  %v1417_v42 = vmax.f32 %v1353_v33, 0.0 }
 0x2a7   :  { %v1469_v30 = vadd.f32 %v1468_v63, %v1416_v28  ;;  %v1418_v1 = vmax.f32 %v1354_v49, 0.0 }
 0x2a8   :  { %v1484_v51 = vadd.f32 %v1483_v0, %v1417_v42 }
 0x2a9   :  { %v1499_v12 = vadd.f32 %v1498_v27, %v1418_v1  ;;  %v1239_v31 = vpop.f32.mrb[4].mxu1 }
 0x2aa   :  { %v1355_v32 = vadd.f32 %v2663_v61, %v1239_v31  ;;  %v1241_v2 = vpop.f32.mrb[5].mxu1 }
 0x2ab   :  { %v1356_v13 = vadd.f32 %v2665_v62, %v1241_v2  ;;  %v1243_v34 = vpop.f32.mrb[6].mxu1 }
 0x2ac   :  { %v1419_v36 = vmax.f32 %v1355_v32, 0.0  ;;  %v1357_v60 = vadd.f32 %v2663_v61, %v1243_v34  ;;  %v1245_v14 = vpop.f32.mrb[7].mxu1 }
 0x2ad   :  { %v1420_v37 = vmax.f32 %v1356_v13, 0.0  ;;  %v1358_v38 = vadd.f32 %v2665_v62, %v1245_v14 }
 0x2ae   :  { %v1455_v39 = vadd.f32 %v1454_v29, %v1419_v36  ;;  %v1421_v17 = vmax.f32 %v1357_v60, 0.0 }
 0x2af   :  { %v1470_v6 = vadd.f32 %v1469_v30, %v1420_v37  ;;  %v1422_v3 = vmax.f32 %v1358_v38, 0.0 }
 0x2b0   :  { %v1485_v40 = vadd.f32 %v1484_v51, %v1421_v17 }
 0x2b1   :  { %v1500_v41 = vadd.f32 %v1499_v12, %v1422_v3  ;;  %v1249_v43 = vpop.f32.mrb[8].mxu1 }
 0x2b2   :  { %v1359_v4 = vadd.f32 %v2663_v61, %v1249_v43  ;;  %v1251_v44 = vpop.f32.mrb[9].mxu1 }
 0x2b3   :  { %v1360_v18 = vadd.f32 %v2665_v62, %v1251_v44  ;;  %v1253_v45 = vpop.f32.mrb[10].mxu1 }
 0x2b4   :  { %v1423_v16 = vmax.f32 %v1359_v4, 0.0  ;;  %v1361_v5 = vadd.f32 %v2663_v61, %v1253_v45  ;;  %v1255_v19 = vpop.f32.mrb[11].mxu1 }
 0x2b5   :  { %v1424_v46 = vmax.f32 %v1360_v18, 0.0  ;;  %v1362_v47 = vadd.f32 %v2665_v62, %v1255_v19 }
 0x2b6   :  { %v1456_v48 = vadd.f32 %v1455_v39, %v1423_v16  ;;  %v1425_v20 = vmax.f32 %v1361_v5, 0.0 }
 0x2b7   :  { %v1471_v7 = vadd.f32 %v1470_v6, %v1424_v46  ;;  %v1426_v50 = vmax.f32 %v1362_v47, 0.0 }
 0x2b8   :  { %v1486_v52 = vadd.f32 %v1485_v40, %v1425_v20 }
 0x2b9   :  { %v1501_v21 = vadd.f32 %v1500_v41, %v1426_v50  ;;  %v1259_v25 = vpop.f32.mrb[12].mxu1 }
 0x2ba   :  { %v1363_v53 = vadd.f32 %v2663_v61, %v1259_v25  ;;  %v1261_v54 = vpop.f32.mrb[13].mxu1 }
 0x2bb   :  { %v1364_v55 = vadd.f32 %v2665_v62, %v1261_v54  ;;  %v1263_v56 = vpop.f32.mrb[14].mxu1 }
 0x2bc   :  { %v1427_v8 = vmax.f32 %v1363_v53, 0.0  ;;  %v1365_v57 = vadd.f32 %v2663_v61, %v1263_v56  ;;  %v1265_v22 = vpop.f32.mrb[15].mxu1 }
 0x2bd   :  { %v1428_v58 = vmax.f32 %v1364_v55, 0.0  ;;  %v1366_v59 = vadd.f32 %v2665_v62, %v1265_v22 }
 0x2be   :  { %v1457_v9 = vadd.f32 %v1456_v48, %v1427_v8  ;;  %v1429_v23 = vmax.f32 %v1365_v57, 0.0 }
 0x2bf   :  { %v1472_v63 = vadd.f32 %v1471_v7, %v1428_v58  ;;  %v1430_v15 = vmax.f32 %v1366_v59, 0.0 }
 0x2c0   :  { %v1487_v26 = vadd.f32 %v1486_v52, %v1429_v23 }
 0x2c1   :  { %v1502_v0 = vadd.f32 %v1501_v21, %v1430_v15  ;;  %v1269_v10 = vpop.f32.mrb[16].mxu1 }
 0x2c2   :  { %v1367_v35 = vadd.f32 %v2663_v61, %v1269_v10  ;;  %v1271_v27 = vpop.f32.mrb[17].mxu1 }
 0x2c3   :  { %v1368_v24 = vadd.f32 %v2665_v62, %v1271_v27  ;;  %v1273_v33 = vpop.f32.mrb[18].mxu1 }
 0x2c4   :  { %v1431_v11 = vmax.f32 %v1367_v35, 0.0  ;;  %v1369_v28 = vadd.f32 %v2663_v61, %v1273_v33  ;;  %v1275_v49 = vpop.f32.mrb[19].mxu1 }
 0x2c5   :  { %v1432_v29 = vmax.f32 %v1368_v24, 0.0  ;;  %v1370_v42 = vadd.f32 %v2665_v62, %v1275_v49 }
 0x2c6   :  { %v1458_v30 = vadd.f32 %v1457_v9, %v1431_v11  ;;  %v1433_v1 = vmax.f32 %v1369_v28, 0.0  ;;  %v1800_v11 = vld [vmem:[%s2774_s6] ss:$0 sm:$0xff] }
 0x2c7   :  { %v1473_v51 = vadd.f32 %v1472_v63, %v1432_v29  ;;  %v1434_v12 = vmax.f32 %v1370_v42, 0.0 }
 0x2c8   :  { %v1488_v31 = vadd.f32 %v1487_v26, %v1433_v1 }
 0x2c9   :  { %v1503_v32 = vadd.f32 %v1502_v0, %v1434_v12  ;;  %v1279_v2 = vpop.f32.mrb[20].mxu1 }
 0x2ca   :  { %v1371_v13 = vadd.f32 %v2663_v61, %v1279_v2  ;;  %v1281_v34 = vpop.f32.mrb[21].mxu1 }
 0x2cb   :  { %v1372_v36 = vadd.f32 %v2665_v62, %v1281_v34  ;;  %v1283_v60 = vpop.f32.mrb[22].mxu1 }
 0x2cc   :  { %v1435_v14 = vmax.f32 %v1371_v13, 0.0  ;;  %v1373_v37 = vadd.f32 %v2663_v61, %v1283_v60  ;;  %v1285_v38 = vpop.f32.mrb[23].mxu1 }
 0x2cd   :  { %v1436_v39 = vmax.f32 %v1372_v36, 0.0  ;;  %v1374_v17 = vadd.f32 %v2665_v62, %v1285_v38 }
 0x2ce   :  { %v1459_v6 = vadd.f32 %v1458_v30, %v1435_v14  ;;  %v1437_v3 = vmax.f32 %v1373_v37, 0.0 }
 0x2cf   :  { %v1474_v40 = vadd.f32 %v1473_v51, %v1436_v39  ;;  %v1438_v41 = vmax.f32 %v1374_v17, 0.0 }
 0x2d0   :  { %v1489_v43 = vadd.f32 %v1488_v31, %v1437_v3 }
 0x2d1   :  { %v1504_v4 = vadd.f32 %v1503_v32, %v1438_v41  ;;  %v1289_v44 = vpop.f32.mrb[24].mxu1 }
 0x2d2   :  { %v1375_v18 = vadd.f32 %v2663_v61, %v1289_v44  ;;  %v1291_v45 = vpop.f32.mrb[25].mxu1 }
 0x2d3   :  { %v1376_v16 = vadd.f32 %v2665_v62, %v1291_v45  ;;  %v1293_v5 = vpop.f32.mrb[26].mxu1 }
 0x2d4   :  { %v1439_v19 = vmax.f32 %v1375_v18, 0.0  ;;  %v1377_v46 = vadd.f32 %v2663_v61, %v1293_v5  ;;  %v1295_v47 = vpop.f32.mrb[27].mxu1 }
 0x2d5   :  { %v1440_v48 = vmax.f32 %v1376_v16, 0.0  ;;  %v1378_v20 = vadd.f32 %v2665_v62, %v1295_v47 }
 0x2d6   :  { %v1460_v7 = vadd.f32 %v1459_v6, %v1439_v19  ;;  %v1441_v50 = vmax.f32 %v1377_v46, 0.0 }
 0x2d7   :  { %v1475_v52 = vadd.f32 %v1474_v40, %v1440_v48  ;;  %v1442_v21 = vmax.f32 %v1378_v20, 0.0 }
 0x2d8   :  { %v1490_v25 = vadd.f32 %v1489_v43, %v1441_v50 }
 0x2d9   :  { %v1505_v53 = vadd.f32 %v1504_v4, %v1442_v21  ;;  %v1299_v54 = vpop.f32.mrb[28].mxu1 }
 0x2da   :  { %v1379_v55 = vadd.f32 %v2663_v61, %v1299_v54  ;;  %v1301_v56 = vpop.f32.mrb[29].mxu1 }
 0x2db   :  { %v1380_v8 = vadd.f32 %v2665_v62, %v1301_v56  ;;  %v1303_v57 = vpop.f32.mrb[30].mxu1 }
 0x2dc   :  { %v1443_v22 = vmax.f32 %v1379_v55, 0.0  ;;  %v1381_v58 = vadd.f32 %v2663_v61, %v1303_v57  ;;  %v1305_v59 = vpop.f32.mrb[31].mxu1 }
 0x2dd   :  { %v1444_v9 = vmax.f32 %v1380_v8, 0.0  ;;  %v1382_v23 = vadd.f32 %v2665_v62, %v1305_v59 }
 0x2de   :  { %v1461_v63 = vadd.f32 %v1460_v7, %v1443_v22  ;;  %v1445_v15 = vmax.f32 %v1381_v58, 0.0 }
 0x2df   :  { %v1476_v26 = vadd.f32 %v1475_v52, %v1444_v9  ;;  %v1446_v0 = vmax.f32 %v1382_v23, 0.0 }
 0x2e0   :  { %v1491_v10 = vadd.f32 %v1490_v25, %v1445_v15 }
 0x2e1   :  { %v1506_v35 = vadd.f32 %v1505_v53, %v1446_v0 }
 0x2e2   :  { %v1507_v27 = vpack.c.bf16 %v1491_v10, %v1461_v63 }
 0x2e3   :  { %v1508_v24 = vpack.c.bf16 %v1506_v35, %v1476_v26 }
 0x2e5   :  { %1676 = vmatprep.mubr.bf16.mxu0 %v1508_v24 }
 0x2e6   :  { %1677 = vmatmul.mubr.bf16.vlgmr.msra.gmra.mrb[96].mxu0 %v1507_v27 }
 0x3b9   :  { %v1833_v33 = vpop.f32.mrb[96].mxu0 }
 0x3ba   :  { %v1834_v61 = vpop.f32.mrb[97].mxu0 }
 0x3bb   :  { %v1835_v28 = vadd.f32 %v1834_v61, %v1833_v33  ;;  %v1836_v49 = vpop.f32.mrb[98].mxu0 }
 0x3bc   :  { %v1837_v29 = vpop.f32.mrb[99].mxu0 }
 0x3bd   :  { %v1679_v62 = vadd.f32 %v1835_v28, %v1800_v11  ;;  %v1838_v42 = vadd.f32 %v1837_v29, %v1836_v49 }
 0x3bf   :  { %1685 = vst [vmem:[%s2775_s7] sm:$0xff] %v1679_v62  ;;  %v1682_v30 = vadd.f32 %v1838_v42, %v1800_v11 }
 0x3c1   :  { %1686 = vst [vmem:[%s2775_s7 + $0x8] sm:$0xff] %v1682_v30 }

</bundles_post_ra>
